<compile_context>
chip_gen: v5e
topology: v5e:2x2
jax: 0.10.0
libtpu: 0.0.40
codegen_flags: <defaults>
</compile_context>

<pallas_src>
from functools import partial

import jax
import jax.numpy as jnp
from jax.experimental import pallas as pl
from jax.experimental.pallas import tpu as pltpu

EPS = 1e-5


def _round_up(a: int, b: int) -> int:
    return (a + b - 1) // b * b


# --------------------------------------------------------------------------- #
# Kernel A: two-phase streaming forward.
#   phase 0: h = x@W1, accumulate sum/sumsq of h (BN1 stats), fold BN1 affine.
#   phase 1: recompute h, BN1-normalize+ReLU, y = h@W2, write y, accumulate
#            sum/sumsq of y (BN2 stats); last tile emits folded BN2 scale/shift.
# --------------------------------------------------------------------------- #
def _fwd_kernel(x_ref, w1_ref, g1_ref, beta1_ref, w2_ref,        # inputs
                y_ref, scale2_ref, shift2_ref,                   # outputs
                sum1_ref, sq1_ref, scale1_ref, shift1_ref,       # VMEM scratch (hid)
                sum2_ref, sq2_ref,                               # VMEM scratch (out)
                *, n_valid, tile_rows):
    phase = pl.program_id(0)
    t = pl.program_id(1)
    n_tiles = pl.num_programs(1)
    inv_n = 1.0 / float(n_valid)

    # Validity mask for padded rows of the (possibly ragged) last tile.
    rows = jax.lax.broadcasted_iota(jnp.int32, (tile_rows, 1), 0) + t * tile_rows
    row_mask = rows < n_valid

    def matmul1():
        # bf16 MXU inputs, f32 accumulation.
        return jnp.dot(x_ref[...].astype(jnp.bfloat16), w1_ref[...],
                       preferred_element_type=jnp.float32)

    # ---------------- phase 0: BN1 statistics ----------------
    @pl.when(phase == 0)
    def _():
        @pl.when(t == 0)
        def _():
            sum1_ref[...] = jnp.zeros_like(sum1_ref)
            sq1_ref[...] = jnp.zeros_like(sq1_ref)
            sum2_ref[...] = jnp.zeros_like(sum2_ref)
            sq2_ref[...] = jnp.zeros_like(sq2_ref)
            y_ref[...] = jnp.zeros_like(y_ref)           # init resident output block
            scale2_ref[...] = jnp.zeros_like(scale2_ref)  # defined content until final
            shift2_ref[...] = jnp.zeros_like(shift2_ref)

        h = matmul1()
        hm = jnp.where(row_mask, h, 0.0)
        sum1_ref[...] += jnp.sum(hm, axis=0, keepdims=True)
        sq1_ref[...] += jnp.sum(hm * hm, axis=0, keepdims=True)

        @pl.when(t == n_tiles - 1)
        def _():
            mean = sum1_ref[...] * inv_n
            var = jnp.maximum(sq1_ref[...] * inv_n - mean * mean, 0.0)
            s = g1_ref[...] * jax.lax.rsqrt(var + EPS)
            scale1_ref[...] = s
            shift1_ref[...] = beta1_ref[...] - mean * s

    # ---------------- phase 1: forward to y + BN2 statistics ----------------
    @pl.when(phase == 1)
    def _():
        h = matmul1()
        h = jnp.maximum(h * scale1_ref[...] + shift1_ref[...], 0.0)   # folded BN1 + ReLU
        y = jnp.dot(h.astype(jnp.bfloat16), w2_ref[...],
                    preferred_element_type=jnp.float32)
        y_ref[...] = y
        ym = jnp.where(row_mask, y, 0.0)
        sum2_ref[...] += jnp.sum(ym, axis=0, keepdims=True)
        sq2_ref[...] += jnp.sum(ym * ym, axis=0, keepdims=True)

        @pl.when(t == n_tiles - 1)
        def _():
            mean2 = sum2_ref[...] * inv_n
            var2 = jnp.maximum(sq2_ref[...] * inv_n - mean2 * mean2, 0.0)
            s2 = jax.lax.rsqrt(var2 + EPS)
            scale2_ref[...] = s2
            shift2_ref[...] = -mean2 * s2


# --------------------------------------------------------------------------- #
# Kernel B: BN2 (no affine) applied as a single FMA, tiled over batch, in place.
# --------------------------------------------------------------------------- #
def _bn2_kernel(y_ref, scale_ref, shift_ref, o_ref):
    o_ref[...] = y_ref[...] * scale_ref[...] + shift_ref[...]


@partial(jax.jit, static_argnames=("block_rows",))
def global_embedding(x, w1, b1, g1, beta1, w2, b2, block_rows=256):
    # b1/b2 are mathematically dead under training-mode BatchNorm (mean subtraction
    # cancels them); they are accepted for interface compatibility and ignored.
    del b1, b2

    n, in_dim = x.shape
    hid = w1.shape[1]
    out_dim = w2.shape[1]

    x = x.astype(jnp.float32)
    g1 = g1.reshape(1, hid).astype(jnp.float32)
    beta1 = beta1.reshape(1, hid).astype(jnp.float32)
    w1_bf = w1.astype(jnp.bfloat16)
    w2_bf = w2.astype(jnp.bfloat16)

    # Batch tile: multiple of 8 sublanes, capped by block_rows (>=128 recommended
    # at production sizes; tiny batches collapse to a single tile).
    tile = _round_up(min(block_rows, _round_up(n, 8)), 8)
    n_pad = _round_up(n, tile)
    n_tiles = n_pad // tile
    if n_pad != n:
        x = jnp.pad(x, ((0, n_pad - n), (0, 0)))

    # VMEM budget: double-buffered x/y tiles + resident bf16 weights + params/scratch.
    vmem_est = (2 * tile * in_dim * 4 + in_dim * hid * 2 + hid * out_dim * 2
                + 2 * tile * out_dim * 4 + 12 * hid * 4 + 12 * out_dim * 4)
    vmem_limit = int(min(max(2 * vmem_est, 16 * 1024 * 1024), 64 * 1024 * 1024))

    flops = 2 * n_pad * in_dim * hid * 2 + 2 * n_pad * hid * out_dim
    bytes_accessed = (2 * n_pad * in_dim * 4 + in_dim * hid * 2 + hid * out_dim * 2
                      + 4 * hid * 4 + n_pad * out_dim * 4 + 4 * out_dim * 4)

    grid_spec = pltpu.PrefetchScalarGridSpec(
        num_scalar_prefetch=0,
        grid=(2, n_tiles),                      # (phase, batch tile); tile fastest
        in_specs=[
            pl.BlockSpec((tile, in_dim), lambda p, t: (t, 0)),     # x (re-read per phase)
            pl.BlockSpec((in_dim, hid), lambda p, t: (0, 0)),      # W1 resident
            pl.BlockSpec((1, hid), lambda p, t: (0, 0)),           # gamma1 resident
            pl.BlockSpec((1, hid), lambda p, t: (0, 0)),           # beta1 resident
            pl.BlockSpec((hid, out_dim), lambda p, t: (0, 0)),     # W2 resident
        ],
        out_specs=[
            # y: block 0 (resident, untouched) during phase 0, tile t in phase 1.
            pl.BlockSpec((tile, out_dim), lambda p, t: (t * p, 0)),
            pl.BlockSpec((1, out_dim), lambda p, t: (0, 0)),       # BN2 folded scale
            pl.BlockSpec((1, out_dim), lambda p, t: (0, 0)),       # BN2 folded shift
        ],
        scratch_shapes=[pltpu.VMEM((1, hid), jnp.float32)] * 4
                     + [pltpu.VMEM((1, out_dim), jnp.float32)] * 2,
    )

    y_pad, scale2, shift2 = pl.pallas_call(
        partial(_fwd_kernel, n_valid=n, tile_rows=tile),
        grid_spec=grid_spec,
        out_shape=(jax.ShapeDtypeStruct((n_pad, out_dim), jnp.float32),
                   jax.ShapeDtypeStruct((1, out_dim), jnp.float32),
                   jax.ShapeDtypeStruct((1, out_dim), jnp.float32)),
        compiler_params=pltpu.CompilerParams(
            dimension_semantics=("arbitrary", "arbitrary"),
            vmem_limit_bytes=vmem_limit),
        cost_estimate=pl.CostEstimate(flops=flops, transcendentals=hid + out_dim,
                                      bytes_accessed=bytes_accessed),
    )(x, w1_bf, g1, beta1, w2_bf)

    out = pl.pallas_call(
        _bn2_kernel,
        grid_spec=pltpu.PrefetchScalarGridSpec(
            num_scalar_prefetch=0,
            grid=(n_tiles,),
            in_specs=[
                pl.BlockSpec((tile, out_dim), lambda i: (i, 0)),
                pl.BlockSpec((1, out_dim), lambda i: (0, 0)),
                pl.BlockSpec((1, out_dim), lambda i: (0, 0)),
            ],
            out_specs=pl.BlockSpec((tile, out_dim), lambda i: (i, 0))),
        out_shape=jax.ShapeDtypeStruct((n_pad, out_dim), jnp.float32),
        compiler_params=pltpu.CompilerParams(dimension_semantics=("parallel",)),
        input_output_aliases={0: 0},        # normalize y in place
    )(y_pad, scale2, shift2)

    return out[:n]


# ----------------------------- references ---------------------------------- #
def reference_f32(x, w1, b1, g1, beta1, w2, b2):
    """Full-precision PyTorch training-mode semantics (with biases)."""
    h = x @ w1 + b1
    m1 = h.mean(0, keepdims=True)
    v1 = ((h - m1) ** 2).mean(0, keepdims=True)
    h = (h - m1) * jax.lax.rsqrt(v1 + EPS) * g1 + beta1
    h = jnp.maximum(h, 0.0)
    y = h @ w2 + b2
    m2 = y.mean(0, keepdims=True)
    v2 = ((y - m2) ** 2).mean(0, keepdims=True)
    return (y - m2) * jax.lax.rsqrt(v2 + EPS)


def reference_matched(x, w1, g1, beta1, w2):
    """Mirrors the kernel numerics: bf16 matmul inputs, f32 stats, folded affine."""
    n = x.shape[0]
    h = jnp.dot(x.astype(jnp.bfloat16), w1.astype(jnp.bfloat16),
                preferred_element_type=jnp.float32)
    m1 = jnp.sum(h, 0, keepdims=True) / n
    v1 = jnp.maximum(jnp.sum(h * h, 0, keepdims=True) / n - m1 * m1, 0.0)
    s1 = g1 * jax.lax.rsqrt(v1 + EPS)
    h = jnp.maximum(h * s1 + (beta1 - m1 * s1), 0.0)
    y = jnp.dot(h.astype(jnp.bfloat16), w2.astype(jnp.bfloat16),
                preferred_element_type=jnp.float32)
    m2 = jnp.sum(y, 0, keepdims=True) / n
    v2 = jnp.maximum(jnp.sum(y * y, 0, keepdims=True) / n - m2 * m2, 0.0)
    s2 = jax.lax.rsqrt(v2 + EPS)
    return y * s2 - m2 * s2


if __name__ == "__main__":
    # Small shapes consistent with the module (input_dim, hidden_dim, output_dim).
    # batch=200 with block_rows=64 -> 4 batch tiles, last tile partially padded,
    # which exercises the streaming-stats path and the padded-row masking.
    batch, input_dim, hidden_dim, output_dim = 200, 128, 256, 128

    key = jax.random.PRNGKey(0)
    kx, kw1, kb1, kw2, kb2, kg1, kbeta1 = jax.random.split(key, 7)

    x = jax.random.normal(kx, (batch, input_dim), jnp.float32)
    w1 = jax.random.normal(kw1, (input_dim, hidden_dim), jnp.float32) / jnp.sqrt(input_dim)
    b1 = 0.01 * jax.random.normal(kb1, (1, hidden_dim), jnp.float32)
    g1 = 1.0 + 0.1 * jax.random.normal(kg1, (1, hidden_dim), jnp.float32)   # BN1 weight
    beta1 = 0.1 * jax.random.normal(kbeta1, (1, hidden_dim), jnp.float32)   # BN1 bias
    w2 = jax.random.normal(kw2, (hidden_dim, output_dim), jnp.float32) / jnp.sqrt(hidden_dim)
    b2 = 0.01 * jax.random.normal(kb2, (1, output_dim), jnp.float32)

    out = global_embedding(x, w1, b1, g1, beta1, w2, b2, block_rows=64)
    out = jax.block_until_ready(out)
    assert out.shape == (batch, output_dim)

    # Tight check vs a reference with matched numerics (validates kernel structure).
    ref_m = reference_matched(x, w1, g1, beta1, w2)
    assert jnp.allclose(out, ref_m, atol=2e-3, rtol=0.0), "mismatch vs matched-precision reference"

    # Loose check vs full-f32 PyTorch training-mode semantics (biases included in the
    # reference; they cancel under BatchNorm, residual diff is bf16 matmul precision).
    ref_full = reference_f32(x, w1, b1, g1, beta1, w2, b2)
    assert jnp.allclose(out, ref_full, atol=6e-2, rtol=0.0), "mismatch vs f32 reference"

    print("KERNEL_OK")
</pallas_src>

<mosaic_0001>
module attributes {stable_mosaic.version = 11 : i64} {
  func.func @_fwd_kernel(%arg0: i32, %arg1: i32, %arg2: memref<64x128xf32, #tpu.memory_space<vmem>>, %arg3: memref<128x256xbf16, #tpu.memory_space<vmem>>, %arg4: memref<1x256xf32, #tpu.memory_space<vmem>>, %arg5: memref<1x256xf32, #tpu.memory_space<vmem>>, %arg6: memref<256x128xbf16, #tpu.memory_space<vmem>>, %arg7: memref<64x128xf32, #tpu.memory_space<vmem>>, %arg8: memref<1x128xf32, #tpu.memory_space<vmem>>, %arg9: memref<1x128xf32, #tpu.memory_space<vmem>>, %arg10: memref<1x256xf32, #tpu.memory_space<vmem>>, %arg11: memref<1x256xf32, #tpu.memory_space<vmem>>, %arg12: memref<1x256xf32, #tpu.memory_space<vmem>>, %arg13: memref<1x256xf32, #tpu.memory_space<vmem>>, %arg14: memref<1x128xf32, #tpu.memory_space<vmem>>, %arg15: memref<1x128xf32, #tpu.memory_space<vmem>>) attributes {dimension_semantics = [#tpu.dimension_semantics<arbitrary>, #tpu.dimension_semantics<arbitrary>], iteration_bounds = array<i64: 2, 4>, scalar_prefetch = 0 : i64, scratch_operands = 6 : i64, tpu.core_type = #tpu.core_type<tc>, window_params = [{transform_indices = @transform_0, window_bounds = array<i64: 64, 128>}, {pipeline_mode = #tpu.pipeline_mode<synchronous>, transform_indices = @transform_1, window_bounds = array<i64: 128, 256>}, {pipeline_mode = #tpu.pipeline_mode<synchronous>, transform_indices = @transform_2, window_bounds = array<i64: 1, 256>}, {pipeline_mode = #tpu.pipeline_mode<synchronous>, transform_indices = @transform_3, window_bounds = array<i64: 1, 256>}, {pipeline_mode = #tpu.pipeline_mode<synchronous>, transform_indices = @transform_4, window_bounds = array<i64: 256, 128>}, {transform_indices = @transform_5, window_bounds = array<i64: 64, 128>}, {pipeline_mode = #tpu.pipeline_mode<synchronous>, transform_indices = @transform_6, window_bounds = array<i64: 1, 128>}, {pipeline_mode = #tpu.pipeline_mode<synchronous>, transform_indices = @transform_7, window_bounds = array<i64: 1, 128>}]} {
    %0 = tpu.iota {dimensions = array<i32: 0>} : vector<64x1xi32>
    %c64_i32 = arith.constant 64 : i32
    %1 = arith.muli %arg1, %c64_i32 : i32
    %2 = vector.broadcast %1 : i32 to vector<64x1xi32>
    %3 = arith.addi %0, %2 : vector<64x1xi32>
    %c200_i32 = arith.constant 200 : i32
    %4 = vector.broadcast %c200_i32 : i32 to vector<64x1xi32>
    %5 = arith.cmpi slt, %3, %4 : vector<64x1xi32>
    %c0_i32 = arith.constant 0 : i32
    %6 = arith.cmpi eq, %arg0, %c0_i32 : i32
    %7 = arith.extui %6 : i1 to i32
    %c0_i32_0 = arith.constant 0 : i32
    %8 = arith.cmpi ne, %7, %c0_i32_0 : i32
    scf.if %8 {
      %c0_i32_2 = arith.constant 0 : i32
      %12 = arith.cmpi eq, %arg1, %c0_i32_2 : i32
      %13 = arith.extui %12 : i1 to i32
      %c0_i32_3 = arith.constant 0 : i32
      %14 = arith.cmpi ne, %13, %c0_i32_3 : i32
      scf.if %14 {
        %cst_19 = arith.constant 0.000000e+00 : f32
        %37 = vector.broadcast %cst_19 : f32 to vector<1x256xf32>
        %c0_20 = arith.constant 0 : index
        %c0_21 = arith.constant 0 : index
        %38 = vector.load %arg10[%c0_20, %c0_21] : memref<1x256xf32, #tpu.memory_space<vmem>>, vector<1x256xf32>
        tpu.vector_store %arg10[%c0_20, %c0_21], %37 {strides = array<i32>} : memref<1x256xf32, #tpu.memory_space<vmem>>, vector<1x256xf32>,
        %cst_22 = arith.constant 0.000000e+00 : f32
        %39 = vector.broadcast %cst_22 : f32 to vector<1x256xf32>
        %c0_23 = arith.constant 0 : index
        %c0_24 = arith.constant 0 : index
        %40 = vector.load %arg11[%c0_23, %c0_24] : memref<1x256xf32, #tpu.memory_space<vmem>>, vector<1x256xf32>
        tpu.vector_store %arg11[%c0_23, %c0_24], %39 {strides = array<i32>} : memref<1x256xf32, #tpu.memory_space<vmem>>, vector<1x256xf32>,
        %cst_25 = arith.constant 0.000000e+00 : f32
        %41 = vector.broadcast %cst_25 : f32 to vector<1x128xf32>
        %c0_26 = arith.constant 0 : index
        %c0_27 = arith.constant 0 : index
        %42 = vector.load %arg14[%c0_26, %c0_27] : memref<1x128xf32, #tpu.memory_space<vmem>>, vector<1x128xf32>
        tpu.vector_store %arg14[%c0_26, %c0_27], %41 {strides = array<i32>} : memref<1x128xf32, #tpu.memory_space<vmem>>, vector<1x128xf32>,
        %cst_28 = arith.constant 0.000000e+00 : f32
        %43 = vector.broadcast %cst_28 : f32 to vector<1x128xf32>
        %c0_29 = arith.constant 0 : index
        %c0_30 = arith.constant 0 : index
        %44 = vector.load %arg15[%c0_29, %c0_30] : memref<1x128xf32, #tpu.memory_space<vmem>>, vector<1x128xf32>
        tpu.vector_store %arg15[%c0_29, %c0_30], %43 {strides = array<i32>} : memref<1x128xf32, #tpu.memory_space<vmem>>, vector<1x128xf32>,
        %cst_31 = arith.constant 0.000000e+00 : f32
        %45 = vector.broadcast %cst_31 : f32 to vector<64x128xf32>
        %c0_32 = arith.constant 0 : index
        %c0_33 = arith.constant 0 : index
        %46 = vector.load %arg7[%c0_32, %c0_33] : memref<64x128xf32, #tpu.memory_space<vmem>>, vector<64x128xf32>
        tpu.vector_store %arg7[%c0_32, %c0_33], %45 {strides = array<i32>} : memref<64x128xf32, #tpu.memory_space<vmem>>, vector<64x128xf32>,
        %cst_34 = arith.constant 0.000000e+00 : f32
        %47 = vector.broadcast %cst_34 : f32 to vector<1x128xf32>
        %c0_35 = arith.constant 0 : index
        %c0_36 = arith.constant 0 : index
        %48 = vector.load %arg8[%c0_35, %c0_36] : memref<1x128xf32, #tpu.memory_space<vmem>>, vector<1x128xf32>
        tpu.vector_store %arg8[%c0_35, %c0_36], %47 {strides = array<i32>} : memref<1x128xf32, #tpu.memory_space<vmem>>, vector<1x128xf32>,
        %cst_37 = arith.constant 0.000000e+00 : f32
        %49 = vector.broadcast %cst_37 : f32 to vector<1x128xf32>
        %c0_38 = arith.constant 0 : index
        %c0_39 = arith.constant 0 : index
        %50 = vector.load %arg9[%c0_38, %c0_39] : memref<1x128xf32, #tpu.memory_space<vmem>>, vector<1x128xf32>
        tpu.vector_store %arg9[%c0_38, %c0_39], %49 {strides = array<i32>} : memref<1x128xf32, #tpu.memory_space<vmem>>, vector<1x128xf32>,
      } else {
      }
      %c0 = arith.constant 0 : index
      %c0_4 = arith.constant 0 : index
      %15 = vector.load %arg2[%c0, %c0_4] : memref<64x128xf32, #tpu.memory_space<vmem>>, vector<64x128xf32>
      %16 = arith.truncf %15 : vector<64x128xf32> to vector<64x128xbf16>
      %c0_5 = arith.constant 0 : index
      %c0_6 = arith.constant 0 : index
      %17 = vector.load %arg3[%c0_5, %c0_6] : memref<128x256xbf16, #tpu.memory_space<vmem>>, vector<128x256xbf16>
      %cst = arith.constant dense<0.000000e+00> : vector<64x256xf32>
      %18 = tpu.matmul %16, %17, %cst {dimension_numbers = #tpu.dot_dimension_numbers<[1], [0], [0], [1], [0, 0, 1, 1], [], []>} : vector<64x128xbf16>, vector<128x256xbf16>, vector<64x256xf32> -> vector<64x256xf32>
      %cst_7 = arith.constant 0.000000e+00 : f32
      %19 = vector.shape_cast %5 : vector<64x1xi1> to vector<64x1xi1>
      %20 = vector.broadcast %19 : vector<64x1xi1> to vector<64x256xi1>
      %21 = vector.broadcast %cst_7 : f32 to vector<64x256xf32>
      %22 = arith.select %20, %18, %21 : vector<64x256xi1>, vector<64x256xf32>
      %c0_8 = arith.constant 0 : index
      %c0_9 = arith.constant 0 : index
      %23 = vector.load %arg10[%c0_8, %c0_9] : memref<1x256xf32, #tpu.memory_space<vmem>>, vector<1x256xf32>
      %cst_10 = arith.constant dense<0.000000e+00> : vector<256xf32>
      %24 = vector.multi_reduction <add>, %22, %cst_10 [0] : vector<64x256xf32> to vector<256xf32>
      %25 = vector.shape_cast %24 : vector<256xf32> to vector<1x256xf32>
      %26 = arith.addf %23, %25 : vector<1x256xf32>
      %c0_11 = arith.constant 0 : index
      %c0_12 = arith.constant 0 : index
      %27 = vector.load %arg10[%c0_11, %c0_12] : memref<1x256xf32, #tpu.memory_space<vmem>>, vector<1x256xf32>
      tpu.vector_store %arg10[%c0_11, %c0_12], %26 {strides = array<i32>} : memref<1x256xf32, #tpu.memory_space<vmem>>, vector<1x256xf32>,
      %c0_13 = arith.constant 0 : index
      %c0_14 = arith.constant 0 : index
      %28 = vector.load %arg11[%c0_13, %c0_14] : memref<1x256xf32, #tpu.memory_space<vmem>>, vector<1x256xf32>
      %29 = arith.mulf %22, %22 : vector<64x256xf32>
      %cst_15 = arith.constant dense<0.000000e+00> : vector<256xf32>
      %30 = vector.multi_reduction <add>, %29, %cst_15 [0] : vector<64x256xf32> to vector<256xf32>
      %31 = vector.shape_cast %30 : vector<256xf32> to vector<1x256xf32>
      %32 = arith.addf %28, %31 : vector<1x256xf32>
      %c0_16 = arith.constant 0 : index
      %c0_17 = arith.constant 0 : index
      %33 = vector.load %arg11[%c0_16, %c0_17] : memref<1x256xf32, #tpu.memory_space<vmem>>, vector<1x256xf32>
      tpu.vector_store %arg11[%c0_16, %c0_17], %32 {strides = array<i32>} : memref<1x256xf32, #tpu.memory_space<vmem>>, vector<1x256xf32>,
      %c3_i32 = arith.constant 3 : i32
      %34 = arith.cmpi eq, %arg1, %c3_i32 : i32
      %35 = arith.extui %34 : i1 to i32
      %c0_i32_18 = arith.constant 0 : i32
      %36 = arith.cmpi ne, %35, %c0_i32_18 : i32
      scf.if %36 {
        %c0_19 = arith.constant 0 : index
        %c0_20 = arith.constant 0 : index
        %37 = vector.load %arg10[%c0_19, %c0_20] : memref<1x256xf32, #tpu.memory_space<vmem>>, vector<1x256xf32>
        %cst_21 = arith.constant 5.000000e-03 : f32
        %38 = vector.broadcast %cst_21 : f32 to vector<1x256xf32>
        %39 = arith.mulf %37, %38 : vector<1x256xf32>
        %c0_22 = arith.constant 0 : index
        %c0_23 = arith.constant 0 : index
        %40 = vector.load %arg11[%c0_22, %c0_23] : memref<1x256xf32, #tpu.memory_space<vmem>>, vector<1x256xf32>
        %cst_24 = arith.constant 5.000000e-03 : f32
        %41 = vector.broadcast %cst_24 : f32 to vector<1x256xf32>
        %42 = arith.mulf %40, %41 : vector<1x256xf32>
        %43 = arith.mulf %39, %39 : vector<1x256xf32>
        %44 = arith.subf %42, %43 : vector<1x256xf32>
        %cst_25 = arith.constant 0.000000e+00 : f32
        %45 = vector.broadcast %cst_25 : f32 to vector<1x256xf32>
        %46 = arith.maximumf %44, %45 : vector<1x256xf32>
        %c0_26 = arith.constant 0 : index
        %c0_27 = arith.constant 0 : index
        %47 = vector.load %arg4[%c0_26, %c0_27] : memref<1x256xf32, #tpu.memory_space<vmem>>, vector<1x256xf32>
        %cst_28 = arith.constant 9.99999974E-6 : f32
        %48 = vector.broadcast %cst_28 : f32 to vector<1x256xf32>
        %49 = arith.addf %46, %48 : vector<1x256xf32>
        %50 = math.rsqrt %49 : vector<1x256xf32>
        %51 = arith.mulf %47, %50 : vector<1x256xf32>
        %c0_29 = arith.constant 0 : index
        %c0_30 = arith.constant 0 : index
        %52 = vector.load %arg12[%c0_29, %c0_30] : memref<1x256xf32, #tpu.memory_space<vmem>>, vector<1x256xf32>
        tpu.vector_store %arg12[%c0_29, %c0_30], %51 {strides = array<i32>} : memref<1x256xf32, #tpu.memory_space<vmem>>, vector<1x256xf32>,
        %c0_31 = arith.constant 0 : index
        %c0_32 = arith.constant 0 : index
        %53 = vector.load %arg5[%c0_31, %c0_32] : memref<1x256xf32, #tpu.memory_space<vmem>>, vector<1x256xf32>
        %54 = arith.mulf %39, %51 : vector<1x256xf32>
        %55 = arith.subf %53, %54 : vector<1x256xf32>
        %c0_33 = arith.constant 0 : index
        %c0_34 = arith.constant 0 : index
        %56 = vector.load %arg13[%c0_33, %c0_34] : memref<1x256xf32, #tpu.memory_space<vmem>>, vector<1x256xf32>
        tpu.vector_store %arg13[%c0_33, %c0_34], %55 {strides = array<i32>} : memref<1x256xf32, #tpu.memory_space<vmem>>, vector<1x256xf32>,
      } else {
      }
    } else {
    }
    %c1_i32 = arith.constant 1 : i32
    %9 = arith.cmpi eq, %arg0, %c1_i32 : i32
    %10 = arith.extui %9 : i1 to i32
    %c0_i32_1 = arith.constant 0 : i32
    %11 = arith.cmpi ne, %10, %c0_i32_1 : i32
    scf.if %11 {
      %c0 = arith.constant 0 : index
      %c0_2 = arith.constant 0 : index
      %12 = vector.load %arg2[%c0, %c0_2] : memref<64x128xf32, #tpu.memory_space<vmem>>, vector<64x128xf32>
      %13 = arith.truncf %12 : vector<64x128xf32> to vector<64x128xbf16>
      %c0_3 = arith.constant 0 : index
      %c0_4 = arith.constant 0 : index
      %14 = vector.load %arg3[%c0_3, %c0_4] : memref<128x256xbf16, #tpu.memory_space<vmem>>, vector<128x256xbf16>
      %cst = arith.constant dense<0.000000e+00> : vector<64x256xf32>
      %15 = tpu.matmul %13, %14, %cst {dimension_numbers = #tpu.dot_dimension_numbers<[1], [0], [0], [1], [0, 0, 1, 1], [], []>} : vector<64x128xbf16>, vector<128x256xbf16>, vector<64x256xf32> -> vector<64x256xf32>
      %c0_5 = arith.constant 0 : index
      %c0_6 = arith.constant 0 : index
      %16 = vector.load %arg12[%c0_5, %c0_6] : memref<1x256xf32, #tpu.memory_space<vmem>>, vector<1x256xf32>
      %17 = vector.broadcast %16 : vector<1x256xf32> to vector<64x256xf32>
      %18 = arith.mulf %15, %17 : vector<64x256xf32>
      %c0_7 = arith.constant 0 : index
      %c0_8 = arith.constant 0 : index
      %19 = vector.load %arg13[%c0_7, %c0_8] : memref<1x256xf32, #tpu.memory_space<vmem>>, vector<1x256xf32>
      %20 = vector.broadcast %19 : vector<1x256xf32> to vector<64x256xf32>
      %21 = arith.addf %18, %20 : vector<64x256xf32>
      %cst_9 = arith.constant 0.000000e+00 : f32
      %22 = vector.broadcast %cst_9 : f32 to vector<64x256xf32>
      %23 = arith.maximumf %21, %22 : vector<64x256xf32>
      %24 = arith.truncf %23 : vector<64x256xf32> to vector<64x256xbf16>
      %c0_10 = arith.constant 0 : index
      %c0_11 = arith.constant 0 : index
      %25 = vector.load %arg6[%c0_10, %c0_11] : memref<256x128xbf16, #tpu.memory_space<vmem>>, vector<256x128xbf16>
      %cst_12 = arith.constant dense<0.000000e+00> : vector<64x128xf32>
      %26 = tpu.matmul %24, %25, %cst_12 {dimension_numbers = #tpu.dot_dimension_numbers<[1], [0], [0], [1], [0, 0, 1, 1], [], []>} : vector<64x256xbf16>, vector<256x128xbf16>, vector<64x128xf32> -> vector<64x128xf32>
      %c0_13 = arith.constant 0 : index
      %c0_14 = arith.constant 0 : index
      %27 = vector.load %arg7[%c0_13, %c0_14] : memref<64x128xf32, #tpu.memory_space<vmem>>, vector<64x128xf32>
      tpu.vector_store %arg7[%c0_13, %c0_14], %26 {strides = array<i32>} : memref<64x128xf32, #tpu.memory_space<vmem>>, vector<64x128xf32>,
      %cst_15 = arith.constant 0.000000e+00 : f32
      %28 = vector.shape_cast %5 : vector<64x1xi1> to vector<64x1xi1>
      %29 = vector.broadcast %28 : vector<64x1xi1> to vector<64x128xi1>
      %30 = vector.broadcast %cst_15 : f32 to vector<64x128xf32>
      %31 = arith.select %29, %26, %30 : vector<64x128xi1>, vector<64x128xf32>
      %c0_16 = arith.constant 0 : index
      %c0_17 = arith.constant 0 : index
      %32 = vector.load %arg14[%c0_16, %c0_17] : memref<1x128xf32, #tpu.memory_space<vmem>>, vector<1x128xf32>
      %cst_18 = arith.constant dense<0.000000e+00> : vector<128xf32>
      %33 = vector.multi_reduction <add>, %31, %cst_18 [0] : vector<64x128xf32> to vector<128xf32>
      %34 = vector.shape_cast %33 : vector<128xf32> to vector<1x128xf32>
      %35 = arith.addf %32, %34 : vector<1x128xf32>
      %c0_19 = arith.constant 0 : index
      %c0_20 = arith.constant 0 : index
      %36 = vector.load %arg14[%c0_19, %c0_20] : memref<1x128xf32, #tpu.memory_space<vmem>>, vector<1x128xf32>
      tpu.vector_store %arg14[%c0_19, %c0_20], %35 {strides = array<i32>} : memref<1x128xf32, #tpu.memory_space<vmem>>, vector<1x128xf32>,
      %c0_21 = arith.constant 0 : index
      %c0_22 = arith.constant 0 : index
      %37 = vector.load %arg15[%c0_21, %c0_22] : memref<1x128xf32, #tpu.memory_space<vmem>>, vector<1x128xf32>
      %38 = arith.mulf %31, %31 : vector<64x128xf32>
      %cst_23 = arith.constant dense<0.000000e+00> : vector<128xf32>
      %39 = vector.multi_reduction <add>, %38, %cst_23 [0] : vector<64x128xf32> to vector<128xf32>
      %40 = vector.shape_cast %39 : vector<128xf32> to vector<1x128xf32>
      %41 = arith.addf %37, %40 : vector<1x128xf32>
      %c0_24 = arith.constant 0 : index
      %c0_25 = arith.constant 0 : index
      %42 = vector.load %arg15[%c0_24, %c0_25] : memref<1x128xf32, #tpu.memory_space<vmem>>, vector<1x128xf32>
      tpu.vector_store %arg15[%c0_24, %c0_25], %41 {strides = array<i32>} : memref<1x128xf32, #tpu.memory_space<vmem>>, vector<1x128xf32>,
      %c3_i32 = arith.constant 3 : i32
      %43 = arith.cmpi eq, %arg1, %c3_i32 : i32
      %44 = arith.extui %43 : i1 to i32
      %c0_i32_26 = arith.constant 0 : i32
      %45 = arith.cmpi ne, %44, %c0_i32_26 : i32
      scf.if %45 {
        %c0_27 = arith.constant 0 : index
        %c0_28 = arith.constant 0 : index
        %46 = vector.load %arg14[%c0_27, %c0_28] : memref<1x128xf32, #tpu.memory_space<vmem>>, vector<1x128xf32>
        %cst_29 = arith.constant 5.000000e-03 : f32
        %47 = vector.broadcast %cst_29 : f32 to vector<1x128xf32>
        %48 = arith.mulf %46, %47 : vector<1x128xf32>
        %c0_30 = arith.constant 0 : index
        %c0_31 = arith.constant 0 : index
        %49 = vector.load %arg15[%c0_30, %c0_31] : memref<1x128xf32, #tpu.memory_space<vmem>>, vector<1x128xf32>
        %cst_32 = arith.constant 5.000000e-03 : f32
        %50 = vector.broadcast %cst_32 : f32 to vector<1x128xf32>
        %51 = arith.mulf %49, %50 : vector<1x128xf32>
        %52 = arith.mulf %48, %48 : vector<1x128xf32>
        %53 = arith.subf %51, %52 : vector<1x128xf32>
        %cst_33 = arith.constant 0.000000e+00 : f32
        %54 = vector.broadcast %cst_33 : f32 to vector<1x128xf32>
        %55 = arith.maximumf %53, %54 : vector<1x128xf32>
        %cst_34 = arith.constant 9.99999974E-6 : f32
        %56 = vector.broadcast %cst_34 : f32 to vector<1x128xf32>
        %57 = arith.addf %55, %56 : vector<1x128xf32>
        %58 = math.rsqrt %57 : vector<1x128xf32>
        %c0_35 = arith.constant 0 : index
        %c0_36 = arith.constant 0 : index
        %59 = vector.load %arg8[%c0_35, %c0_36] : memref<1x128xf32, #tpu.memory_space<vmem>>, vector<1x128xf32>
        tpu.vector_store %arg8[%c0_35, %c0_36], %58 {strides = array<i32>} : memref<1x128xf32, #tpu.memory_space<vmem>>, vector<1x128xf32>,
        %cst_37 = arith.constant 0.000000e+00 : f32
        %60 = vector.broadcast %cst_37 : f32 to vector<1x128xf32>
        %61 = arith.subf %60, %48 : vector<1x128xf32>
        %62 = arith.mulf %61, %58 : vector<1x128xf32>
        %c0_38 = arith.constant 0 : index
        %c0_39 = arith.constant 0 : index
        %63 = vector.load %arg9[%c0_38, %c0_39] : memref<1x128xf32, #tpu.memory_space<vmem>>, vector<1x128xf32>
        tpu.vector_store %arg9[%c0_38, %c0_39], %62 {strides = array<i32>} : memref<1x128xf32, #tpu.memory_space<vmem>>, vector<1x128xf32>,
      } else {
      }
    } else {
    }
    return
  }
  func.func @transform_0(%arg0: i32, %arg1: i32) -> (i32, i32) {
    %c0_i32 = arith.constant 0 : i32
    %c0_i32_0 = arith.constant 0 : i32
    return %arg1, %c0_i32 : i32, i32
  }
  func.func @transform_1(%arg0: i32, %arg1: i32) -> (i32, i32) {
    %c0_i32 = arith.constant 0 : i32
    %c0_i32_0 = arith.constant 0 : i32
    %c0_i32_1 = arith.constant 0 : i32
    return %c0_i32, %c0_i32_0 : i32, i32
  }
  func.func @transform_2(%arg0: i32, %arg1: i32) -> (i32, i32) {
    %c0_i32 = arith.constant 0 : i32
    %c0_i32_0 = arith.constant 0 : i32
    %c0_i32_1 = arith.constant 0 : i32
    return %c0_i32, %c0_i32_0 : i32, i32
  }
  func.func @transform_3(%arg0: i32, %arg1: i32) -> (i32, i32) {
    %c0_i32 = arith.constant 0 : i32
    %c0_i32_0 = arith.constant 0 : i32
    %c0_i32_1 = arith.constant 0 : i32
    return %c0_i32, %c0_i32_0 : i32, i32
  }
  func.func @transform_4(%arg0: i32, %arg1: i32) -> (i32, i32) {
    %c0_i32 = arith.constant 0 : i32
    %c0_i32_0 = arith.constant 0 : i32
    %c0_i32_1 = arith.constant 0 : i32
    return %c0_i32, %c0_i32_0 : i32, i32
  }
  func.func @transform_5(%arg0: i32, %arg1: i32) -> (i32, i32) {
    %0 = arith.muli %arg1, %arg0 : i32
    %c0_i32 = arith.constant 0 : i32
    %c0_i32_0 = arith.constant 0 : i32
    return %0, %c0_i32 : i32, i32
  }
  func.func @transform_6(%arg0: i32, %arg1: i32) -> (i32, i32) {
    %c0_i32 = arith.constant 0 : i32
    %c0_i32_0 = arith.constant 0 : i32
    %c0_i32_1 = arith.constant 0 : i32
    return %c0_i32, %c0_i32_0 : i32, i32
  }
  func.func @transform_7(%arg0: i32, %arg1: i32) -> (i32, i32) {
    %c0_i32 = arith.constant 0 : i32
    %c0_i32_0 = arith.constant 0 : i32
    %c0_i32_1 = arith.constant 0 : i32
    return %c0_i32, %c0_i32_0 : i32, i32
  }
}

module attributes {stable_mosaic.version = 11 : i64} {
  func.func @_bn2_kernel(%arg0: i32, %arg1: memref<64x128xf32, #tpu.memory_space<vmem>>, %arg2: memref<1x128xf32, #tpu.memory_space<vmem>>, %arg3: memref<1x128xf32, #tpu.memory_space<vmem>>, %arg4: memref<64x128xf32, #tpu.memory_space<vmem>>) attributes {dimension_semantics = [#tpu.dimension_semantics<parallel>], iteration_bounds = array<i64: 4>, scalar_prefetch = 0 : i64, scratch_operands = 0 : i64, tpu.core_type = #tpu.core_type<tc>, window_params = [{transform_indices = @transform_0, window_bounds = array<i64: 64, 128>}, {pipeline_mode = #tpu.pipeline_mode<synchronous>, transform_indices = @transform_1, window_bounds = array<i64: 1, 128>}, {pipeline_mode = #tpu.pipeline_mode<synchronous>, transform_indices = @transform_2, window_bounds = array<i64: 1, 128>}, {transform_indices = @transform_3, window_bounds = array<i64: 64, 128>}]} {
    %c0 = arith.constant 0 : index
    %c0_0 = arith.constant 0 : index
    %0 = vector.load %arg1[%c0, %c0_0] : memref<64x128xf32, #tpu.memory_space<vmem>>, vector<64x128xf32>
    %c0_1 = arith.constant 0 : index
    %c0_2 = arith.constant 0 : index
    %1 = vector.load %arg2[%c0_1, %c0_2] : memref<1x128xf32, #tpu.memory_space<vmem>>, vector<1x128xf32>
    %2 = vector.broadcast %1 : vector<1x128xf32> to vector<64x128xf32>
    %3 = arith.mulf %0, %2 : vector<64x128xf32>
    %c0_3 = arith.constant 0 : index
    %c0_4 = arith.constant 0 : index
    %4 = vector.load %arg3[%c0_3, %c0_4] : memref<1x128xf32, #tpu.memory_space<vmem>>, vector<1x128xf32>
    %5 = vector.broadcast %4 : vector<1x128xf32> to vector<64x128xf32>
    %6 = arith.addf %3, %5 : vector<64x128xf32>
    %c0_5 = arith.constant 0 : index
    %c0_6 = arith.constant 0 : index
    %7 = vector.load %arg4[%c0_5, %c0_6] : memref<64x128xf32, #tpu.memory_space<vmem>>, vector<64x128xf32>
    tpu.vector_store %arg4[%c0_5, %c0_6], %6 {strides = array<i32>} : memref<64x128xf32, #tpu.memory_space<vmem>>, vector<64x128xf32>,
    return
  }
  func.func @transform_0(%arg0: i32) -> (i32, i32) {
    %c0_i32 = arith.constant 0 : i32
    %c0_i32_0 = arith.constant 0 : i32
    return %arg0, %c0_i32 : i32, i32
  }
  func.func @transform_1(%arg0: i32) -> (i32, i32) {
    %c0_i32 = arith.constant 0 : i32
    %c0_i32_0 = arith.constant 0 : i32
    %c0_i32_1 = arith.constant 0 : i32
    return %c0_i32, %c0_i32_0 : i32, i32
  }
  func.func @transform_2(%arg0: i32) -> (i32, i32) {
    %c0_i32 = arith.constant 0 : i32
    %c0_i32_0 = arith.constant 0 : i32
    %c0_i32_1 = arith.constant 0 : i32
    return %c0_i32, %c0_i32_0 : i32, i32
  }
  func.func @transform_3(%arg0: i32) -> (i32, i32) {
    %c0_i32 = arith.constant 0 : i32
    %c0_i32_0 = arith.constant 0 : i32
    return %arg0, %c0_i32 : i32, i32
  }
}

</mosaic_0001>

<bundles_post_ra>
// kernel: global_embedding.3
= control target key start
LH: loop header
LB: loop body
LE: loop exit
PB: predicated region body
PF: predicated region fallthrough
CT: control target
= control target key end

     0   :  { %s319_s12 = smov 0   ;;  %s342_s0 = inlined_call_operand.vmem [shape: f32[256,128], index: 0, kind: input, shape index: {}, may-alias: {0,3}]   ;;  %s343_s1 = inlined_call_operand.vmem [shape: f32[1,128], index: 1, kind: input, shape index: {}]   ;;  %s344_s2 = inlined_call_operand.vmem [shape: f32[1,128], index: 2, kind: input, shape index: {}]   ;;  %s345_s3 = inlined_call_operand.vmem [shape: f32[256,128], index: 3, kind: output, shape index: {}, may-alias: {0,3}]  }
   0x1 LB: > { %s270_s13 = sadd.s32 4294967295, %s297_s12   ;;  %p274_p0 = scmp.ge.s32.totalorder %s297_s12, 1  ;;  %s297_s12 = sphi %s319_s12, %s13_s12  }
   0x2   : > { %p138_p1 = scmp.lt.s32.totalorder %s297_s12, 5 }
   0x4   : > { %p139_p2 = pnand %p274_p0, %p138_p1 }
   0x5   : > { %s275_s14 = sshll.u32 (!%p139_p2), %s270_s13, 3 }
   0x6   : > { %142 = sbr.rel (%p139_p2) target bundleno = 27 (0x1b), region = 32  ;;  %p163_p3 = scmp.lt.s32.totalorder (!%p139_p2), %s275_s14, 31 }
   0xb   : > { %s347_s14 = smov (!%p163_p3, %s275_s14), 31  ;;  %v289_v0 = vld [vmem:[%s343_s1] ss:$0 sm:$0xff] }
   0xc   : > { %s276_s17 = sshll.u32 %s347_s14, 3  ;;  %v290_v1 = vld [vmem:[%s344_s2] ss:$0 sm:$0xff] }
   0xd   : > { %s166_s20 = scalar_lea.vmem %s342_s0, %s276_s17  ;;  %s172_s25 = scalar_lea.vmem %s345_s3, %s276_s17 }
   0xe   : > { %v174_v2 = vld [vmem:[%s166_s20] sm:$0xff]  ;;  %v175_v3 = vld [vmem:[%s166_s20 + $0x8] sm:$0xff]  ;;  %v176_v4 = vld [vmem:[%s166_s20 + $0x10] sm:$0xff] }
   0xf   : > { %v177_v5 = vld [vmem:[%s166_s20 + $0x18] sm:$0xff]  ;;  %v178_v6 = vld [vmem:[%s166_s20 + $0x20] sm:$0xff]  ;;  %v179_v7 = vld [vmem:[%s166_s20 + $0x28] sm:$0xff]  ;;  %v186_v8 = vmul.f32 %v289_v0, %v174_v2  ;;  %v187_v9 = vmul.f32 %v289_v0, %v175_v3  ;;  %v188_v10 = vmul.f32 %v289_v0, %v176_v4 }
  0x10   : > { %v180_v11 = vld [vmem:[%s166_s20 + $0x30] sm:$0xff]  ;;  %v181_v12 = vld [vmem:[%s166_s20 + $0x38] sm:$0xff]  ;;  %v189_v13 = vmul.f32 %v289_v0, %v177_v5  ;;  %v190_v14 = vmul.f32 %v289_v0, %v178_v6  ;;  %v191_v15 = vmul.f32 %v289_v0, %v179_v7 }
  0x11   : > { %v192_v16 = vmul.f32 %v289_v0, %v180_v11  ;;  %v198_v17 = vadd.f32 %v290_v1, %v186_v8  ;;  %v199_v18 = vadd.f32 %v290_v1, %v187_v9  ;;  %v193_v19 = vmul.f32 %v289_v0, %v181_v12 }
  0x12   : > { %v200_v20 = vadd.f32 %v290_v1, %v188_v10  ;;  %v201_v21 = vadd.f32 %v290_v1, %v189_v13  ;;  %v202_v22 = vadd.f32 %v290_v1, %v190_v14  ;;  %v203_v23 = vadd.f32 %v290_v1, %v191_v15 }
  0x13   : > { %206 = vst [vmem:[%s172_s25] sm:$0xff] %v198_v17  ;;  %v204_v24 = vadd.f32 %v290_v1, %v192_v16  ;;  %v205_v25 = vadd.f32 %v290_v1, %v193_v19 }
  0x14   : > { %207 = vst [vmem:[%s172_s25 + $0x8] sm:$0xff] %v199_v18 }
  0x15   : > { %208 = vst [vmem:[%s172_s25 + $0x10] sm:$0xff] %v200_v20 }
  0x16   : > { %209 = vst [vmem:[%s172_s25 + $0x18] sm:$0xff] %v201_v21 }
  0x17   : > { %210 = vst [vmem:[%s172_s25 + $0x20] sm:$0xff] %v202_v22 }
  0x18   : > { %211 = vst [vmem:[%s172_s25 + $0x28] sm:$0xff] %v203_v23 }
  0x19   : > { %212 = vst [vmem:[%s172_s25 + $0x30] sm:$0xff] %v204_v24 }
  0x1a   : > { %213 = vst [vmem:[%s172_s25 + $0x38] sm:$0xff] %v205_v25 }
  0x1b PF: > { %s13_s12 = sadd.s32 1, %s297_s12  }
  0x1c   : > { %p10_p4 = scmp.ge.s32.totalorder %s13_s12, 6  }
  0x1e   :  { %12 = sbr.rel (!%p10_p4) target bundleno = 1 (0x1), region = 62 }

// kernel: global_embedding.2
= control target key start
LH: loop header
LB: loop body
LE: loop exit
PB: predicated region body
PF: predicated region fallthrough
CT: control target
= control target key end

     0   :  { %s1667_s24 = smov 0   ;;  %s1669_s25 = smov 0   ;;  %s2153_s0 = inlined_call_operand.vmem [shape: f32[256,128], index: 0, kind: input, shape index: {}]   ;;  %s2154_s1 = inlined_call_operand.vmem [shape: bf16[128,256], index: 1, kind: input, shape index: {}]   ;;  %s2155_s2 = inlined_call_operand.vmem [shape: f32[1,256], index: 2, kind: input, shape index: {}]   ;;  %s2156_s3 = inlined_call_operand.vmem [shape: f32[1,256], index: 3, kind: input, shape index: {}]   ;;  %s2157_s4 = inlined_call_operand.vmem [shape: bf16[256,128], index: 4, kind: input, shape index: {}]   ;;  %s2158_s5 = inlined_call_operand.vmem [shape: f32[256,128], index: 5, kind: output, shape index: {0}]   ;;  %s2159_s6 = inlined_call_operand.vmem [shape: f32[1,128], index: 6, kind: output, shape index: {1}]   ;;  %s2160_s7 = inlined_call_operand.vmem [shape: f32[1,128], index: 7, kind: output, shape index: {2}]  }
   0x1   :  { %s1671_s26 = smov 0   ;;  %s1673_s27 = smov 0  }
   0x2   :  { %s1675_s28 = smov 0  }
   0x3 LB: > { %s27_s29 = sadd.s32 1, %s1616_s26  ;;  %s30_s30 = sadd.s32 1, %s1620_s27  ;;  %s1624_s28 = sphi %s1675_s28, %s18_s28   ;;  %s1620_s27 = sphi %s1673_s27, %s2166_s27   ;;  %s1616_s26 = sphi %s1671_s26, %s2165_s26   ;;  %s1612_s25 = sphi %s1669_s25, %s2164_s25   ;;  %s1608_s24 = sphi %s1667_s24, %s2163_s24  }
   0x4   : > { %p28_p0 = scmp.ge.s32.totalorder %s27_s29, 4  ;;  %p1272_p1 = scmp.ge.s32.totalorder %s1624_s28, 1 }
   0x5   : > { %p247_p2 = scmp.lt.s32.totalorder %s1624_s28, 9 }
   0x6   : > { %s2168_s29 = smov (%p28_p0, %s27_s29), 0  ;;  %s2170_s30 = smov (!%p28_p0, %s30_s30), %s1620_s27 }
   0x7   : > { %p248_p3 = pnand %p1272_p1, %p247_p2  ;;  %p32_p4 = scmp.ge.s32.totalorder %s2170_s30, 2 }
   0x8   : > { %s1273_s8 = sshll.u32 (!%p248_p3), %s1608_s24, 3  ;;  %s286_s9 = smul.u32 (!%p248_p3), %s1608_s24, %s1612_s25 }
   0x9   : > { %s2172_s30 = smov (%p32_p4, %s2170_s30), 0  ;;  %251 = sbr.rel (%p248_p3) target bundleno = 730 (0x2da), region = 40 }
   0xa   : > { %p281_p5 = scmp.lt.s32.totalorder (!%p248_p3), %s1273_s8, 31  ;;  %s1277_s10 = sshll.u32 (!%p248_p3), %s1608_s24, 6 }
   0xb   : > { %s1275_s11 = sshll.u32 (!%p248_p3), %s286_s9, 3  ;;  %p1278_p7 = scmp.ne.s32.totalorder (!%p248_p3), %s1612_s25, 0 }
   0xc   : > { %p288_p6 = scmp.lt.s32.totalorder (!%p248_p3), %s1275_s11, 31 }
   0xe   : > { %v294_v0 = vlaneseq  ;;  %v304_v2 = vstv %s1277_s10  ;;  %s2174_s8 = smov (!%p281_p5, %s1273_s8), 31  ;;  %s2176_s11 = smov (!%p288_p6, %s1275_s11), 31 }
   0xf   : > { %s1274_s12 = sshll.u32 %s2174_s8, 3  ;;  %s1276_s16 = sshll.u32 %s2176_s11, 3 }
  0x10   : > { %v295_v1 = vshrl.u32 %v294_v0, 7  ;;  %s1711_s15 = scalar_lea.vmem %s2153_s0, %s1274_s12  ;;  %s1739_s19 = scalar_lea.vmem %s2158_s5, %s1276_s16 }
  0x11   : > { %p1279_p8 = scmp.ne.s32.totalorder (!%p1278_p7), %s1608_s24, 0 }
  0x12   : > { %v296_v3 = vadd.s32 8, %v295_v1  ;;  %v297_v4 = vadd.s32 16, %v295_v1  ;;  %v298_v5 = vadd.s32 24, %v295_v1  ;;  %v299_v6 = vadd.s32 32, %v295_v1 }
  0x13   : > { %v300_v7 = vadd.s32 40, %v295_v1  ;;  %v301_v8 = vadd.s32 48, %v295_v1  ;;  %v302_v9 = vadd.s32 56, %v295_v1  ;;  %v1706_v10 = vadd.s32 %v304_v2, %v295_v1  ;;  %324 = sbr.rel (%p1278_p7) target bundleno = 300 (0x12c), region = 44 }
  0x14   : > { %v1713_v11 = vadd.s32 %v304_v2, %v296_v3  ;;  %v1715_v12 = vadd.s32 %v304_v2, %v297_v4  ;;  %v1717_v13 = vadd.s32 %v304_v2, %v298_v5  ;;  %v1719_v14 = vadd.s32 %v304_v2, %v299_v6 }
  0x15   : > { %v1722_v15 = vadd.s32 %v304_v2, %v300_v7  ;;  %v1724_v16 = vadd.s32 %v304_v2, %v301_v8  ;;  %v1726_v17 = vadd.s32 %v304_v2, %v302_v9  ;;  %vm313_vm0 = vcmp.lt.s32.totalorder %v1706_v10, 200 }
  0x16   : > { %vm314_vm1 = vcmp.lt.s32.totalorder %v1713_v11, 200  ;;  %vm315_vm2 = vcmp.lt.s32.totalorder %v1715_v12, 200  ;;  %vm316_vm3 = vcmp.lt.s32.totalorder %v1717_v13, 200  ;;  %vm317_vm4 = vcmp.lt.s32.totalorder %v1719_v14, 200 }
  0x17   : > { %vm318_vm5 = vcmp.lt.s32.totalorder %v1722_v15, 200  ;;  %vm319_vm6 = vcmp.lt.s32.totalorder %v1724_v16, 200  ;;  %vm320_vm7 = vcmp.lt.s32.totalorder %v1726_v17, 200 }
  0x18   : > { %328 = sbr.rel (%p1279_p8) target bundleno = 44 (0x2c), region = 48 }
  0x1d   : > { %vm331_vm8 = vcmp.lt.s32.totalorder %v294_v0, 256  ;;  %v1626_v18 = vmov 0.0  }
  0x1e   : > { %333 = vst.msk [vmem:[#allocation2] sm:$0x3] %vm331_vm8, %v1626_v18 }
  0x1f   : > { %334 = vst.msk [vmem:[#allocation3] sm:$0x3] %vm331_vm8, %v1626_v18 }
  0x20   : > { %335 = vst [vmem:[#allocation6] sm:$0x1] %v1626_v18 }
  0x21   : > { %336 = vst [vmem:[#allocation7] sm:$0x1] %v1626_v18 }
  0x22   : > { %337 = vst [vmem:[%s1739_s19] sm:$0xff] %v1626_v18 }
  0x23   : > { %338 = vst [vmem:[%s1739_s19 + $0x8] sm:$0xff] %v1626_v18 }
  0x24   : > { %339 = vst [vmem:[%s1739_s19 + $0x10] sm:$0xff] %v1626_v18 }
  0x25   : > { %340 = vst [vmem:[%s1739_s19 + $0x18] sm:$0xff] %v1626_v18 }
  0x26   : > { %341 = vst [vmem:[%s1739_s19 + $0x20] sm:$0xff] %v1626_v18 }
  0x27   : > { %342 = vst [vmem:[%s1739_s19 + $0x28] sm:$0xff] %v1626_v18 }
  0x28   : > { %343 = vst [vmem:[%s1739_s19 + $0x30] sm:$0xff] %v1626_v18 }
  0x29   : > { %344 = vst [vmem:[%s1739_s19 + $0x38] sm:$0xff] %v1626_v18 }
  0x2a   : > { %345 = vst [vmem:[%s2159_s6] sm:$0x1] %v1626_v18 }
  0x2b   : > { %346 = vst [vmem:[%s2160_s7] sm:$0x1] %v1626_v18 }
  0x2c PF: > { %v1338_v19 = vld [vmem:[%s2154_s1 + $0x70] sm:$0xf]  ;;  %v1492_v20 = vld [vmem:[%s2154_s1 + $0x74] sm:$0xf0]  ;;  %v1491_v21 = vld [vmem:[%s2154_s1 + $0x74] sm:$0xf] }
  0x2d   : > { %v1339_v22 = vor.u32 %v1492_v20, %v1338_v19  ;;  %v1340_v23 = vld [vmem:[%s2154_s1 + $0x78] sm:$0xf0]  ;;  %v1330_v24 = vld [vmem:[%s2154_s1 + $0x60] sm:$0xf]  ;;  %v1490_v25 = vld [vmem:[%s2154_s1 + $0x64] sm:$0xf0] }
  0x2e   : > { %v1343_v26 = vor.u32 %v1491_v21, %v1340_v23  ;;  %v1489_v27 = vld [vmem:[%s2154_s1 + $0x64] sm:$0xf]  ;;  %v1332_v28 = vld [vmem:[%s2154_s1 + $0x68] sm:$0xf0]  ;;  %v1331_v29 = vor.u32 %v1490_v25, %v1330_v24  ;;  %v1322_v31 = vld [vmem:[%s2154_s1 + $0x50] sm:$0xf] }
  0x2f   : > { %455 = vmatpush.bf16.msra.mxu0 %v1339_v22  ;;  %1525 = vmatpush.bf16.msra.mxu2 %v1339_v22  ;;  %v1335_v30 = vor.u32 %v1489_v27, %v1332_v28  ;;  %v1488_v32 = vld [vmem:[%s2154_s1 + $0x54] sm:$0xf0]  ;;  %v1487_v33 = vld [vmem:[%s2154_s1 + $0x54] sm:$0xf]  ;;  %v1324_v34 = vld [vmem:[%s2154_s1 + $0x58] sm:$0xf0] }
  0x30   : > { %484 = vmatpush.bf16.msra.mxu1 %v1343_v26  ;;  %1533 = vmatpush.bf16.msra.mxu3 %v1343_v26  ;;  %v1323_v35 = vor.u32 %v1488_v32, %v1322_v31  ;;  %v1327_v36 = vor.u32 %v1487_v33, %v1324_v34  ;;  %v1314_v37 = vld [vmem:[%s2154_s1 + $0x40] sm:$0xf]  ;;  %v1486_v38 = vld [vmem:[%s2154_s1 + $0x44] sm:$0xf0]  ;;  %v1485_v39 = vld [vmem:[%s2154_s1 + $0x44] sm:$0xf] }
  0x31   : > { %v1316_v40 = vld [vmem:[%s2154_s1 + $0x48] sm:$0xf0]  ;;  %v1315_v41 = vor.u32 %v1486_v38, %v1314_v37  ;;  %v1306_v43 = vld [vmem:[%s2154_s1 + $0x30] sm:$0xf]  ;;  %v1484_v44 = vld [vmem:[%s2154_s1 + $0x34] sm:$0xf0] }
  0x32   : > { %v1319_v42 = vor.u32 %v1485_v39, %v1316_v40  ;;  %v1483_v45 = vld [vmem:[%s2154_s1 + $0x34] sm:$0xf]  ;;  %v1308_v46 = vld [vmem:[%s2154_s1 + $0x38] sm:$0xf0]  ;;  %v1307_v47 = vor.u32 %v1484_v44, %v1306_v43  ;;  %v1298_v49 = vld [vmem:[%s2154_s1 + $0x20] sm:$0xf] }
  0x33   : > { %456 = vmatpush.bf16.msra.mxu0 %v1331_v29  ;;  %1526 = vmatpush.bf16.msra.mxu2 %v1331_v29  ;;  %v1311_v48 = vor.u32 %v1483_v45, %v1308_v46  ;;  %v1482_v50 = vld [vmem:[%s2154_s1 + $0x24] sm:$0xf0]  ;;  %v1481_v51 = vld [vmem:[%s2154_s1 + $0x24] sm:$0xf]  ;;  %v1300_v52 = vld [vmem:[%s2154_s1 + $0x28] sm:$0xf0] }
  0x34   : > { %485 = vmatpush.bf16.msra.mxu1 %v1335_v30  ;;  %1534 = vmatpush.bf16.msra.mxu3 %v1335_v30  ;;  %v1299_v53 = vor.u32 %v1482_v50, %v1298_v49  ;;  %v1303_v54 = vor.u32 %v1481_v51, %v1300_v52  ;;  %v1290_v55 = vld [vmem:[%s2154_s1 + $0x10] sm:$0xf]  ;;  %v1480_v56 = vld [vmem:[%s2154_s1 + $0x14] sm:$0xf0]  ;;  %v1479_v57 = vld [vmem:[%s2154_s1 + $0x14] sm:$0xf] }
  0x35   : > { %v1292_v58 = vld [vmem:[%s2154_s1 + $0x18] sm:$0xf0]  ;;  %v1291_v59 = vor.u32 %v1480_v56, %v1290_v55  ;;  %v1282_v61 = vld [vmem:[%s2154_s1] sm:$0xf]  ;;  %v1478_v62 = vld [vmem:[%s2154_s1 + $0x4] sm:$0xf0] }
  0x36   : > { %v1295_v60 = vor.u32 %v1479_v57, %v1292_v58  ;;  %v1477_v63 = vld [vmem:[%s2154_s1 + $0x4] sm:$0xf]  ;;  %v1284_v1 = vld [vmem:[%s2154_s1 + $0x8] sm:$0xf0]  ;;  %v1283_v3 = vor.u32 %v1478_v62, %v1282_v61  ;;  %v349_v18 = vld [vmem:[%s1711_s15 + $0x10] sm:$0xff]  ;;  %vm575_vm9 = vcmask 1040384  }
  0x37   : > { %457 = vmatpush.bf16.msra.mxu0 %v1323_v35  ;;  %1527 = vmatpush.bf16.msra.mxu2 %v1323_v35  ;;  %v347_v2 = vld [vmem:[%s1711_s15] sm:$0xff]  ;;  %v348_v4 = vld [vmem:[%s1711_s15 + $0x8] sm:$0xff]  ;;  %v1287_v7 = vor.u32 %v1477_v63, %v1284_v1  ;;  %v350_v19 = vld [vmem:[%s1711_s15 + $0x18] sm:$0xff]  ;;  %vm1895_vm10 = vcmp.lt.s32.totalorder %v294_v0, 256  ;;  %p1344_p9 = scmp.ne.s32.totalorder %s1608_s24, 3 }
  0x38   : > { %486 = vmatpush.bf16.msra.mxu1 %v1327_v36  ;;  %1535 = vmatpush.bf16.msra.mxu3 %v1327_v36  ;;  %v351_v5 = vld [vmem:[%s1711_s15 + $0x20] sm:$0xff]  ;;  %v352_v6 = vld [vmem:[%s1711_s15 + $0x28] sm:$0xff]  ;;  %v355_v8 = vpack.c.bf16 %v348_v4, %v347_v2  ;;  %v353_v20 = vld [vmem:[%s1711_s15 + $0x30] sm:$0xff]  ;;  %v356_v22 = vpack.c.bf16 %v350_v19, %v349_v18 }
  0x39   : > { %v357_v9 = vpack.c.bf16 %v352_v6, %v351_v5  ;;  %v354_v21 = vld [vmem:[%s1711_s15 + $0x38] sm:$0xff] }
  0x3a   : > { %v358_v23 = vpack.c.bf16 %v354_v21, %v353_v20 }
  0x3b   : > { %458 = vmatpush.bf16.msra.mxu0 %v1315_v41  ;;  %1528 = vmatpush.bf16.msra.mxu2 %v1315_v41 }
  0x3c   : > { %487 = vmatpush.bf16.msra.mxu1 %v1319_v42  ;;  %1536 = vmatpush.bf16.msra.mxu3 %v1319_v42 }
  0x3f   : > { %459 = vmatpush.bf16.msra.mxu0 %v1307_v47  ;;  %1529 = vmatpush.bf16.msra.mxu2 %v1307_v47 }
  0x40   : > { %488 = vmatpush.bf16.msra.mxu1 %v1311_v48  ;;  %1537 = vmatpush.bf16.msra.mxu3 %v1311_v48 }
  0x43   : > { %460 = vmatpush.bf16.msra.mxu0 %v1299_v53  ;;  %1530 = vmatpush.bf16.msra.mxu2 %v1299_v53 }
  0x44   : > { %489 = vmatpush.bf16.msra.mxu1 %v1303_v54  ;;  %1538 = vmatpush.bf16.msra.mxu3 %v1303_v54 }
  0x47   : > { %461 = vmatpush.bf16.msra.mxu0 %v1291_v59  ;;  %1531 = vmatpush.bf16.msra.mxu2 %v1291_v59 }
  0x48   : > { %490 = vmatpush.bf16.msra.mxu1 %v1295_v60  ;;  %1539 = vmatpush.bf16.msra.mxu3 %v1295_v60 }
  0x4b   : > { %462 = vmatpush.bf16.msra.mxu0 %v1283_v3  ;;  %1532 = vmatpush.bf16.msra.mxu2 %v1283_v3 }
  0x4c   : > { %491 = vmatpush.bf16.msra.mxu1 %v1287_v7  ;;  %1540 = vmatpush.bf16.msra.mxu3 %v1287_v7 }
  0x4e   : > { %463 = vmatmul.bf16.vlgmr.msra.gmra.mxu0 %v355_v8  ;;  %473 = vmatmul.bf16.vlgmr.msra.gmra.mxu2 %v357_v9 }
  0x4f   : > { %492 = vmatmul.bf16.vlgmr.msra.gmra.mxu1 %v355_v8  ;;  %502 = vmatmul.bf16.vlgmr.msra.gmra.mxu3 %v357_v9 }
  0x5e   : > { %468 = vmatmul.bf16.gmra.mxu0 %v356_v22  ;;  %478 = vmatmul.bf16.gmra.mxu2 %v358_v23 }
  0x5f   : > { %497 = vmatmul.bf16.gmra.mxu1 %v356_v22  ;;  %507 = vmatmul.bf16.gmra.mxu3 %v358_v23 }
  0xcb   : > { %v464_v24 = vpop.f32.mrf.mxu0 }
  0xcc   : > { %v493_v25 = vpop.f32.mrf.mxu1  ;;  %v529_v36 = vsel %vm313_vm0, %v464_v24, 0.0 }
  0xcd   : > { %v530_v38 = vsel %vm313_vm0, %v493_v25, 0.0  ;;  %v585_v42 = vmul.f32 %v529_v36, %v529_v36 }
  0xce   : > { %v586_v46 = vmul.f32 %v530_v38, %v530_v38 }
  0xd1   : > { %v474_v26 = vpop.f32.mrf.mxu2 }
  0xd2   : > { %v503_v27 = vpop.f32.mrf.mxu3  ;;  %v537_v50 = vsel %vm317_vm4, %v474_v26, 0.0 }
  0xd3   : > { %v466_v28 = vpop.f32.mrf.mxu0  ;;  %v538_v54 = vsel %vm317_vm4, %v503_v27, 0.0  ;;  %v593_v4 = vmul.f32 %v537_v50, %v537_v50 }
  0xd4   : > { %v495_v29 = vpop.f32.mrf.mxu1  ;;  %v531_v33 = vsel %vm314_vm1, %v466_v28, 0.0  ;;  %v594_v8 = vmul.f32 %v538_v54, %v538_v54 }
  0xd5   : > { %v532_v35 = vsel %vm314_vm1, %v495_v29, 0.0  ;;  %v587_v39 = vmul.f32 %v531_v33, %v531_v33  ;;  %v546_v43 = vadd.f32 %v531_v33, %v529_v36 }
  0xd6   : > { %v588_v41 = vmul.f32 %v532_v35, %v532_v35  ;;  %v559_v47 = vadd.f32 %v532_v35, %v530_v38 }
  0xd7   : > { %v601_v51 = vadd.f32 %v587_v39, %v585_v42 }
  0xd8   : > { %v614_v55 = vadd.f32 %v588_v41, %v586_v46 }
  0xd9   : > { %v476_v30 = vpop.f32.mrf.mxu2 }
  0xda   : > { %v505_v31 = vpop.f32.mrf.mxu3  ;;  %v539_v63 = vsel %vm318_vm5, %v476_v30, 0.0 }
  0xdb   : > { %v469_v32 = vpop.f32.mrf.mxu0  ;;  %v540_v5 = vsel %vm318_vm5, %v505_v31, 0.0  ;;  %v595_v20 = vmul.f32 %v539_v63, %v539_v63 }
  0xdc   : > { %v498_v34 = vpop.f32.mrf.mxu1  ;;  %v533_v37 = vsel %vm315_vm2, %v469_v32, 0.0  ;;  %v596_v25 = vmul.f32 %v540_v5, %v540_v5 }
  0xdd   : > { %v534_v40 = vsel %vm315_vm2, %v498_v34, 0.0  ;;  %v589_v44 = vmul.f32 %v533_v37, %v533_v37  ;;  %v547_v52 = vadd.f32 %v546_v43, %v533_v37 }
  0xde   : > { %v590_v48 = vmul.f32 %v534_v40, %v534_v40  ;;  %v560_v56 = vadd.f32 %v559_v47, %v534_v40 }
  0xdf   : > { %v602_v59 = vadd.f32 %v601_v51, %v589_v44 }
  0xe0   : > { %v615_v1 = vadd.f32 %v614_v55, %v590_v48 }
  0xe1   : > { %v479_v45 = vpop.f32.mrf.mxu2 }
  0xe2   : > { %v508_v49 = vpop.f32.mrf.mxu3  ;;  %v541_v9 = vsel %vm319_vm6, %v479_v45, 0.0 }
  0xe3   : > { %v471_v53 = vpop.f32.mrf.mxu0  ;;  %v542_v21 = vsel %vm319_vm6, %v508_v49, 0.0  ;;  %v597_v30 = vmul.f32 %v541_v9, %v541_v9 }
  0xe4   : > { %v535_v57 = vsel %vm316_vm3, %v471_v53, 0.0  ;;  %v500_v58 = vpop.f32.mrf.mxu1  ;;  %v598_v34 = vmul.f32 %v542_v21, %v542_v21 }
  0xe5   : > { %v548_v60 = vadd.f32 %v547_v52, %v535_v57  ;;  %v591_v61 = vmul.f32 %v535_v57, %v535_v57  ;;  %v536_v62 = vsel %vm316_vm3, %v500_v58, 0.0 }
  0xe6   : > { %v561_v2 = vadd.f32 %v560_v56, %v536_v62  ;;  %v592_v3 = vmul.f32 %v536_v62, %v536_v62 }
  0xe7   : > { %v549_v6 = vadd.f32 %v548_v60, %v537_v50  ;;  %v603_v7 = vadd.f32 %v602_v59, %v591_v61 }
  0xe8   : > { %v562_v18 = vadd.f32 %v561_v2, %v538_v54  ;;  %v616_v19 = vadd.f32 %v615_v1, %v592_v3 }
  0xe9   : > { %v604_v22 = vadd.f32 %v603_v7, %v593_v4  ;;  %v481_v23 = vpop.f32.mrf.mxu2  ;;  %v550_v24 = vadd.f32 %v549_v6, %v539_v63  ;;  %v545_v4 = vld [vmem:[#allocation2] sm:$0x3] }
  0xea   : > { %v617_v26 = vadd.f32 %v616_v19, %v594_v8  ;;  %v543_v27 = vsel %vm320_vm7, %v481_v23, 0.0  ;;  %v510_v28 = vpop.f32.mrf.mxu3  ;;  %v563_v29 = vadd.f32 %v562_v18, %v540_v5  ;;  %v584_v18 = vld [vmem:[#allocation3] sm:$0x3] }
  0xeb   : > { %v551_v31 = vadd.f32 %v550_v24, %v541_v9  ;;  %v605_v32 = vadd.f32 %v604_v22, %v595_v20  ;;  %v544_v33 = vsel %vm320_vm7, %v510_v28, 0.0  ;;  %v599_v38 = vmul.f32 %v543_v27, %v543_v27 }
  0xec   : > { %v564_v35 = vadd.f32 %v563_v29, %v542_v21  ;;  %v618_v36 = vadd.f32 %v617_v26, %v596_v25  ;;  %v600_v41 = vmul.f32 %v544_v33, %v544_v33 }
  0xed   : > { %v552_v37 = vadd.f32 %v551_v31, %v543_v27  ;;  %v606_v39 = vadd.f32 %v605_v32, %v597_v30 }
  0xee   : > { %v565_v40 = vadd.f32 %v564_v35, %v544_v33  ;;  %v619_v42 = vadd.f32 %v618_v36, %v598_v34 }
  0xef   : > { %v553_v43 = vrot.slane %v552_v37, 4  ;;  %v607_v44 = vadd.f32 %v606_v39, %v599_v38 }
  0xf0   : > { %v566_v45 = vrot.slane %v565_v40, 4  ;;  %v620_v46 = vadd.f32 %v619_v42, %v600_v41 }
  0xf1   : > { %v554_v47 = vadd.f32 %v553_v43, %v552_v37  ;;  %v608_v48 = vrot.slane %v607_v44, 4 }
  0xf2   : > { %v567_v49 = vadd.f32 %v566_v45, %v565_v40  ;;  %v621_v50 = vrot.slane %v620_v46, 4 }
  0xf3   : > { %v555_v51 = vrot.slane %v554_v47, 2  ;;  %v609_v52 = vadd.f32 %v608_v48, %v607_v44 }
  0xf4   : > { %v568_v53 = vrot.slane %v567_v49, 2  ;;  %v622_v54 = vadd.f32 %v621_v50, %v620_v46 }
  0xf5   : > { %v556_v55 = vadd.f32 %v555_v51, %v554_v47  ;;  %v610_v56 = vrot.slane %v609_v52, 2 }
  0xf6   : > { %v569_v57 = vadd.f32 %v568_v53, %v567_v49  ;;  %v623_v58 = vrot.slane %v622_v54, 2 }
  0xf7   : > { %v611_v59 = vadd.f32 %v610_v56, %v609_v52  ;;  %v557_v60 = vrot.slane %v556_v55, 1 }
  0xf8   : > { %v570_v61 = vrot.slane %v569_v57, 1  ;;  %v624_v62 = vadd.f32 %v623_v58, %v622_v54 }
  0xf9   : > { %v612_v63 = vrot.slane %v611_v59, 1  ;;  %v558_v3 = vadd.f32 %v557_v60, %v556_v55 }
  0xfa   : > { %v571_v1 = vadd.f32 %v570_v61, %v569_v57  ;;  %v625_v2 = vrot.slane %v624_v62, 1 }
  0xfb   : > { %v613_v7 = vadd.f32 %v612_v63, %v611_v59 }
  0xfc   : > { %v574_v5 = vrot.slane %v571_v1, 7  ;;  %v626_v6 = vadd.f32 %v625_v2, %v624_v62 }
  0xfe   : > { %v576_v8 = vsel %vm575_vm9, %v558_v3, %v574_v5  ;;  %v629_v19 = vrot.slane %v626_v6, 7 }
  0xff   : > { %v578_v20 = vadd.f32 %v576_v8, %v545_v4  ;;  %637 = sbr.rel (%p1344_p9) target bundleno = 300 (0x12c), region = 52 }
 0x100   : > { %v630_v21 = vsel %vm575_vm9, %v613_v7, %v629_v19 }
 0x101   : > { %583 = vst.msk [vmem:[#allocation2] sm:$0x3] %vm1895_vm10, %v578_v20  ;;  %v632_v22 = vadd.f32 %v630_v21, %v584_v18 }
 0x103   : > { %633 = vst.msk [vmem:[#allocation3] sm:$0x3] %vm1895_vm10, %v632_v22 }
 0x104   : > { %v645_v35 = vld [vmem:[%s2155_s2] sm:$0x3] }
 0x105   : > { %v659_v39 = vld [vmem:[%s2156_s3] sm:$0x3] }
 0x108   : > { %v638_v23 = vld [vmem:[#allocation2] sm:$0x3] }
 0x109   : > { %v639_v0 = vmul.f32 0.005, %v638_v23 }
 0x10a   : > { %v640_v24 = vld [vmem:[#allocation3] sm:$0x3] }
 0x10b   : > { %v641_v25 = vmul.f32 0.005, %v640_v24  ;;  %v642_v26 = vmul.f32 %v639_v0, %v639_v0 }
 0x10d   : > { %v643_v27 = vsub.f32 %v641_v25, %v642_v26 }
 0x10f   : > { %v644_v28 = vmax.f32 %v643_v27, 0.0 }
 0x111   : > { %v646_v29 = vadd.f32 1e-05, %v644_v28 }
 0x113   : > { %1582 = vrsqrt.f32 %v646_v29  ;;  %vm653_vm11 = vweird.f32 %v646_v29 }
 0x119   : > { %v1583_v30 = vpop.eup %1582 }
 0x11a   : > { %v648_v31 = vmul.f32 %v1583_v30, %v646_v29  ;;  %vm654_vm12 = vweird.f32 %v1583_v30 }
 0x11b   : > { %vm655_vm13 = vmor %vm653_vm11, %vm654_vm12 }
 0x11c   : > { %v649_v32 = vmul.f32 %v1583_v30, %v648_v31 }
 0x11e   : > { %v650_v33 = vmul.f32 0.5, %v649_v32 }
 0x120   : > { %v651_v34 = vsub.f32 1.5, %v650_v33 }
 0x122   : > { %v652_v36 = vmul.f32 %v1583_v30, %v651_v34 }
 0x124   : > { %v656_v37 = vsel %vm655_vm13, %v1583_v30, %v652_v36 }
 0x125   : > { %v657_v38 = vmul.f32 %v656_v37, %v645_v35 }
 0x127   : > { %658 = vst.msk [vmem:[#allocation4] sm:$0x3] %vm1895_vm10, %v657_v38  ;;  %v660_v40 = vmul.f32 %v657_v38, %v639_v0 }
 0x129   : > { %v661_v41 = vsub.f32 %v659_v39, %v660_v40 }
 0x12b   : > { %662 = vst.msk [vmem:[#allocation5] sm:$0x3] %vm1895_vm10, %v661_v41 }
 0x12c PF: > { %p1345_p10 = scmp.ne.s32.totalorder %s1612_s25, 1 }
 0x12d   : > { %p1474_p11 = scmp.ne.s32.totalorder (!%p1345_p10), %s1608_s24, 3 }
 0x12e   : > { %666 = sbr.rel (%p1345_p10) target bundleno = 730 (0x2da), region = 56 }
 0x133   : > { %v1404_v42 = vld [vmem:[%s2154_s1 + $0x70] sm:$0xf]  ;;  %v1508_v43 = vld [vmem:[%s2154_s1 + $0x74] sm:$0xf0]  ;;  %v1507_v44 = vld [vmem:[%s2154_s1 + $0x74] sm:$0xf] }
 0x134   : > { %v1405_v45 = vor.u32 %v1508_v43, %v1404_v42  ;;  %v1406_v46 = vld [vmem:[%s2154_s1 + $0x78] sm:$0xf0]  ;;  %v1396_v47 = vld [vmem:[%s2154_s1 + $0x60] sm:$0xf]  ;;  %v1506_v48 = vld [vmem:[%s2154_s1 + $0x64] sm:$0xf0] }
 0x135   : > { %v1409_v49 = vor.u32 %v1507_v44, %v1406_v46  ;;  %v1505_v50 = vld [vmem:[%s2154_s1 + $0x64] sm:$0xf]  ;;  %v1398_v51 = vld [vmem:[%s2154_s1 + $0x68] sm:$0xf0]  ;;  %v1397_v52 = vor.u32 %v1506_v48, %v1396_v47  ;;  %v1388_v54 = vld [vmem:[%s2154_s1 + $0x50] sm:$0xf] }
 0x136   : > { %775 = vmatpush.bf16.msra.mxu0 %v1405_v45  ;;  %v1401_v53 = vor.u32 %v1505_v50, %v1398_v51  ;;  %v1504_v55 = vld [vmem:[%s2154_s1 + $0x54] sm:$0xf0]  ;;  %v1503_v56 = vld [vmem:[%s2154_s1 + $0x54] sm:$0xf]  ;;  %v1390_v57 = vld [vmem:[%s2154_s1 + $0x58] sm:$0xf0] }
 0x137   : > { %804 = vmatpush.bf16.msra.mxu1 %v1409_v49  ;;  %v1389_v58 = vor.u32 %v1504_v55, %v1388_v54  ;;  %v1393_v59 = vor.u32 %v1503_v56, %v1390_v57  ;;  %v1380_v60 = vld [vmem:[%s2154_s1 + $0x40] sm:$0xf]  ;;  %v1502_v61 = vld [vmem:[%s2154_s1 + $0x44] sm:$0xf0]  ;;  %v1501_v62 = vld [vmem:[%s2154_s1 + $0x44] sm:$0xf] }
 0x138   : > { %v1382_v63 = vld [vmem:[%s2154_s1 + $0x48] sm:$0xf0]  ;;  %v1381_v1 = vor.u32 %v1502_v61, %v1380_v60  ;;  %v1372_v3 = vld [vmem:[%s2154_s1 + $0x30] sm:$0xf]  ;;  %v1500_v4 = vld [vmem:[%s2154_s1 + $0x34] sm:$0xf0] }
 0x139   : > { %v1385_v2 = vor.u32 %v1501_v62, %v1382_v63  ;;  %v1499_v5 = vld [vmem:[%s2154_s1 + $0x34] sm:$0xf]  ;;  %v1374_v6 = vld [vmem:[%s2154_s1 + $0x38] sm:$0xf0]  ;;  %v1373_v7 = vor.u32 %v1500_v4, %v1372_v3  ;;  %v1364_v9 = vld [vmem:[%s2154_s1 + $0x20] sm:$0xf] }
 0x13a   : > { %776 = vmatpush.bf16.msra.mxu0 %v1397_v52  ;;  %v1377_v8 = vor.u32 %v1499_v5, %v1374_v6  ;;  %v1498_v18 = vld [vmem:[%s2154_s1 + $0x24] sm:$0xf0]  ;;  %v1497_v19 = vld [vmem:[%s2154_s1 + $0x24] sm:$0xf]  ;;  %v1366_v20 = vld [vmem:[%s2154_s1 + $0x28] sm:$0xf0] }
 0x13b   : > { %805 = vmatpush.bf16.msra.mxu1 %v1401_v53  ;;  %v1365_v21 = vor.u32 %v1498_v18, %v1364_v9  ;;  %v1369_v22 = vor.u32 %v1497_v19, %v1366_v20  ;;  %v1356_v23 = vld [vmem:[%s2154_s1 + $0x10] sm:$0xf]  ;;  %v1496_v24 = vld [vmem:[%s2154_s1 + $0x14] sm:$0xf0]  ;;  %v1495_v0 = vld [vmem:[%s2154_s1 + $0x14] sm:$0xf] }
 0x13c   : > { %v1358_v25 = vld [vmem:[%s2154_s1 + $0x18] sm:$0xf0]  ;;  %v1357_v26 = vor.u32 %v1496_v24, %v1356_v23  ;;  %v1348_v28 = vld [vmem:[%s2154_s1] sm:$0xf]  ;;  %v1494_v29 = vld [vmem:[%s2154_s1 + $0x4] sm:$0xf0] }
 0x13d   : > { %v1361_v27 = vor.u32 %v1495_v0, %v1358_v25  ;;  %v1493_v30 = vld [vmem:[%s2154_s1 + $0x4] sm:$0xf]  ;;  %v1350_v31 = vld [vmem:[%s2154_s1 + $0x8] sm:$0xf0]  ;;  %v1349_v32 = vor.u32 %v1494_v29, %v1348_v28  ;;  %v669_v37 = vld [vmem:[%s1711_s15 + $0x10] sm:$0xff] }
 0x13e   : > { %777 = vmatpush.bf16.msra.mxu0 %v1389_v58  ;;  %v667_v33 = vld [vmem:[%s1711_s15] sm:$0xff]  ;;  %v668_v34 = vld [vmem:[%s1711_s15 + $0x8] sm:$0xff]  ;;  %v1353_v35 = vor.u32 %v1493_v30, %v1350_v31  ;;  %v670_v38 = vld [vmem:[%s1711_s15 + $0x18] sm:$0xff] }
 0x13f   : > { %806 = vmatpush.bf16.msra.mxu1 %v1393_v59  ;;  %v675_v36 = vpack.c.bf16 %v668_v34, %v667_v33  ;;  %v676_v39 = vpack.c.bf16 %v670_v38, %v669_v37  ;;  %v1516_v40 = vld [vmem:[%s2157_s4 + $0x38] sm:$0xff]  ;;  %v1515_v42 = vld [vmem:[%s2157_s4 + $0x30] sm:$0xff]  ;;  %v1514_v44 = vld [vmem:[%s2157_s4 + $0x28] sm:$0xff] }
 0x140   : > { %v1524_v41 = vld [vmem:[%s2157_s4 + $0x78] sm:$0xff]  ;;  %1029 = vmatpush.bf16.msra.mxu2 %v1516_v40  ;;  %v1523_v43 = vld [vmem:[%s2157_s4 + $0x70] sm:$0xff]  ;;  %v1522_v45 = vld [vmem:[%s2157_s4 + $0x68] sm:$0xff] }
 0x141   : > { %1058 = vmatpush.bf16.msra.mxu3 %v1524_v41  ;;  %v671_v46 = vld [vmem:[%s1711_s15 + $0x20] sm:$0xff]  ;;  %v672_v47 = vld [vmem:[%s1711_s15 + $0x28] sm:$0xff]  ;;  %v673_v51 = vld [vmem:[%s1711_s15 + $0x30] sm:$0xff] }
 0x142   : > { %778 = vmatpush.bf16.msra.mxu0 %v1381_v1  ;;  %v1513_v48 = vld [vmem:[%s2157_s4 + $0x20] sm:$0xff]  ;;  %v677_v50 = vpack.c.bf16 %v672_v47, %v671_v46  ;;  %v674_v52 = vld [vmem:[%s1711_s15 + $0x38] sm:$0xff]  ;;  %v1511_v56 = vld [vmem:[%s2157_s4 + $0x10] sm:$0xff] }
 0x143   : > { %807 = vmatpush.bf16.msra.mxu1 %v1385_v2  ;;  %v1521_v49 = vld [vmem:[%s2157_s4 + $0x60] sm:$0xff]  ;;  %v678_v53 = vpack.c.bf16 %v674_v52, %v673_v51  ;;  %v1512_v54 = vld [vmem:[%s2157_s4 + $0x18] sm:$0xff]  ;;  %v1519_v57 = vld [vmem:[%s2157_s4 + $0x50] sm:$0xff] }
 0x144   : > { %1030 = vmatpush.bf16.msra.mxu2 %v1515_v42  ;;  %v1520_v55 = vld [vmem:[%s2157_s4 + $0x58] sm:$0xff]  ;;  %v1510_v58 = vld [vmem:[%s2157_s4 + $0x8] sm:$0xff]  ;;  %v1509_v60 = vld [vmem:[%s2157_s4] sm:$0xff] }
 0x145   : > { %1059 = vmatpush.bf16.msra.mxu3 %v1523_v43  ;;  %v1518_v59 = vld [vmem:[%s2157_s4 + $0x48] sm:$0xff]  ;;  %v1517_v61 = vld [vmem:[%s2157_s4 + $0x40] sm:$0xff] }
 0x146   : > { %779 = vmatpush.bf16.msra.mxu0 %v1373_v7  ;;  %v833_v62 = vld [vmem:[#allocation4] sm:$0x3]  ;;  %v855_v3 = vld [vmem:[#allocation5] sm:$0x3] }
 0x147   : > { %808 = vmatpush.bf16.msra.mxu1 %v1377_v8  ;;  %v2067_v1 = vperm.slane %v833_v62, 0  ;;  %v2069_v4 = vperm.slane %v833_v62, 1  ;;  %v2072_v6 = vperm.slane %v855_v3, 0  ;;  %v2075_v8 = vperm.slane %v855_v3, 1 }
 0x148   : > { %1031 = vmatpush.bf16.msra.mxu2 %v1514_v44 }
 0x149   : > { %1060 = vmatpush.bf16.msra.mxu3 %v1522_v45 }
 0x14a   : > { %780 = vmatpush.bf16.msra.mxu0 %v1365_v21 }
 0x14b   : > { %809 = vmatpush.bf16.msra.mxu1 %v1369_v22 }
 0x14c   : > { %1032 = vmatpush.bf16.msra.mxu2 %v1513_v48 }
 0x14d   : > { %1061 = vmatpush.bf16.msra.mxu3 %v1521_v49 }
 0x14e   : > { %781 = vmatpush.bf16.msra.mxu0 %v1357_v26 }
 0x14f   : > { %810 = vmatpush.bf16.msra.mxu1 %v1361_v27 }
 0x150   : > { %1033 = vmatpush.bf16.msra.mxu2 %v1512_v54 }
 0x151   : > { %1062 = vmatpush.bf16.msra.mxu3 %v1520_v55 }
 0x152   : > { %782 = vmatpush.bf16.msra.mxu0 %v1349_v32 }
 0x153   : > { %811 = vmatpush.bf16.msra.mxu1 %v1353_v35 }
 0x154   : > { %1034 = vmatpush.bf16.msra.mxu2 %v1511_v56 }
 0x155   : > { %783 = vmatmul.bf16.vlgmr.msra.gmra.mxu0 %v675_v36  ;;  %1063 = vmatpush.bf16.msra.mxu3 %v1519_v57 }
 0x156   : > { %812 = vmatmul.bf16.vlgmr.msra.gmra.mxu1 %v675_v36 }
 0x158   : > { %1035 = vmatpush.bf16.msra.mxu2 %v1510_v58 }
 0x159   : > { %1064 = vmatpush.bf16.msra.mxu3 %v1518_v59 }
 0x15c   : > { %1036 = vmatpush.bf16.msra.mxu2 %v1509_v60 }
 0x15d   : > { %1065 = vmatpush.bf16.msra.mxu3 %v1517_v61 }
 0x165   : > { %788 = vmatmul.bf16.gmra.mxu0 %v676_v39 }
 0x166   : > { %817 = vmatmul.bf16.gmra.mxu1 %v676_v39 }
 0x175   : > { %793 = vmatmul.bf16.gmra.mxu0 %v677_v50 }
 0x176   : > { %822 = vmatmul.bf16.gmra.mxu1 %v677_v50 }
 0x185   : > { %798 = vmatmul.bf16.gmra.mxu0 %v678_v53 }
 0x186   : > { %827 = vmatmul.bf16.gmra.mxu1 %v678_v53 }
 0x1d2   : > { %v784_v63 = vpop.f32.mrf.mxu0 }
 0x1d3   : > { %v813_v2 = vpop.f32.mrf.mxu1  ;;  %v839_v5 = vmul.f32 %v2067_v1, %v784_v63 }
 0x1d4   : > { %v840_v7 = vmul.f32 %v2069_v4, %v813_v2 }
 0x1d5   : > { %v861_v18 = vadd.f32 %v2072_v6, %v839_v5 }
 0x1d6   : > { %v862_v21 = vadd.f32 %v2075_v8, %v840_v7 }
 0x1d7   : > { %v877_v0 = vmax.f32 %v861_v18, 0.0 }
 0x1d8   : > { %v878_v26 = vmax.f32 %v862_v21, 0.0 }
 0x1da   : > { %v786_v9 = vpop.f32.mrf.mxu0 }
 0x1db   : > { %v841_v19 = vmul.f32 %v2067_v1, %v786_v9  ;;  %v815_v20 = vpop.f32.mrf.mxu1 }
 0x1dc   : > { %v842_v22 = vmul.f32 %v2069_v4, %v815_v20 }
 0x1dd   : > { %v863_v23 = vadd.f32 %v2072_v6, %v841_v19 }
 0x1de   : > { %v864_v24 = vadd.f32 %v2075_v8, %v842_v22 }
 0x1df   : > { %v879_v25 = vmax.f32 %v863_v23, 0.0 }
 0x1e0   : > { %v880_v27 = vmax.f32 %v864_v24, 0.0 }
 0x1e1   : > { %v893_v28 = vpack.c.bf16 %v879_v25, %v877_v0 }
 0x1e2   : > { %v789_v29 = vpop.f32.mrf.mxu0  ;;  %v894_v30 = vpack.c.bf16 %v880_v27, %v878_v26 }
 0x1e3   : > { %v818_v31 = vpop.f32.mrf.mxu1  ;;  %1037 = vmatmul.bf16.vlgmr.msra.gmra.mxu2 %v893_v28  ;;  %v843_v32 = vmul.f32 %v2067_v1, %v789_v29 }
 0x1e4   : > { %1066 = vmatmul.bf16.vlgmr.msra.gmra.mxu3 %v894_v30  ;;  %v844_v33 = vmul.f32 %v2069_v4, %v818_v31 }
 0x1e5   : > { %v865_v35 = vadd.f32 %v2072_v6, %v843_v32 }
 0x1e6   : > { %v866_v38 = vadd.f32 %v2075_v8, %v844_v33 }
 0x1e7   : > { %v881_v42 = vmax.f32 %v865_v35, 0.0 }
 0x1e8   : > { %v882_v44 = vmax.f32 %v866_v38, 0.0 }
 0x1ea   : > { %v791_v34 = vpop.f32.mrf.mxu0 }
 0x1eb   : > { %v845_v36 = vmul.f32 %v2067_v1, %v791_v34  ;;  %v820_v37 = vpop.f32.mrf.mxu1 }
 0x1ec   : > { %v846_v39 = vmul.f32 %v2069_v4, %v820_v37 }
 0x1ed   : > { %v867_v40 = vadd.f32 %v2072_v6, %v845_v36 }
 0x1ee   : > { %v868_v41 = vadd.f32 %v2075_v8, %v846_v39 }
 0x1ef   : > { %v883_v43 = vmax.f32 %v867_v40, 0.0 }
 0x1f0   : > { %v884_v45 = vmax.f32 %v868_v41, 0.0 }
 0x1f1   : > { %v895_v46 = vpack.c.bf16 %v883_v43, %v881_v42 }
 0x1f2   : > { %v794_v47 = vpop.f32.mrf.mxu0  ;;  %v896_v48 = vpack.c.bf16 %v884_v45, %v882_v44 }
 0x1f3   : > { %v823_v49 = vpop.f32.mrf.mxu1  ;;  %1042 = vmatmul.bf16.gmra.mxu2 %v895_v46  ;;  %v847_v50 = vmul.f32 %v2067_v1, %v794_v47 }
 0x1f4   : > { %1071 = vmatmul.bf16.gmra.mxu3 %v896_v48  ;;  %v848_v51 = vmul.f32 %v2069_v4, %v823_v49 }
 0x1f5   : > { %v869_v53 = vadd.f32 %v2072_v6, %v847_v50 }
 0x1f6   : > { %v870_v56 = vadd.f32 %v2075_v8, %v848_v51 }
 0x1f7   : > { %v885_v60 = vmax.f32 %v869_v53, 0.0 }
 0x1f8   : > { %v886_v62 = vmax.f32 %v870_v56, 0.0 }
 0x1fa   : > { %v796_v52 = vpop.f32.mrf.mxu0 }
 0x1fb   : > { %v849_v54 = vmul.f32 %v2067_v1, %v796_v52  ;;  %v825_v55 = vpop.f32.mrf.mxu1 }
 0x1fc   : > { %v850_v57 = vmul.f32 %v2069_v4, %v825_v55 }
 0x1fd   : > { %v871_v58 = vadd.f32 %v2072_v6, %v849_v54 }
 0x1fe   : > { %v872_v59 = vadd.f32 %v2075_v8, %v850_v57 }
 0x1ff   : > { %v887_v61 = vmax.f32 %v871_v58, 0.0 }
 0x200   : > { %v888_v63 = vmax.f32 %v872_v59, 0.0 }
 0x201   : > { %v897_v2 = vpack.c.bf16 %v887_v61, %v885_v60 }
 0x202   : > { %v799_v3 = vpop.f32.mrf.mxu0  ;;  %v898_v5 = vpack.c.bf16 %v888_v63, %v886_v62 }
 0x203   : > { %v828_v7 = vpop.f32.mrf.mxu1  ;;  %1047 = vmatmul.bf16.gmra.mxu2 %v897_v2  ;;  %v851_v9 = vmul.f32 %v2067_v1, %v799_v3 }
 0x204   : > { %1076 = vmatmul.bf16.gmra.mxu3 %v898_v5  ;;  %v852_v18 = vmul.f32 %v2069_v4, %v828_v7 }
 0x205   : > { %v873_v20 = vadd.f32 %v2072_v6, %v851_v9 }
 0x206   : > { %v874_v23 = vadd.f32 %v2075_v8, %v852_v18 }
 0x207   : > { %v889_v26 = vmax.f32 %v873_v20, 0.0 }
 0x208   : > { %v890_v28 = vmax.f32 %v874_v23, 0.0 }
 0x20a   : > { %v801_v19 = vpop.f32.mrf.mxu0 }
 0x20b   : > { %v853_v21 = vmul.f32 %v2067_v1, %v801_v19  ;;  %v830_v22 = vpop.f32.mrf.mxu1 }
 0x20c   : > { %v854_v24 = vmul.f32 %v2069_v4, %v830_v22 }
 0x20d   : > { %v875_v0 = vadd.f32 %v2072_v6, %v853_v21 }
 0x20e   : > { %v876_v25 = vadd.f32 %v2075_v8, %v854_v24 }
 0x20f   : > { %v891_v27 = vmax.f32 %v875_v0, 0.0 }
 0x210   : > { %v892_v29 = vmax.f32 %v876_v25, 0.0 }
 0x211   : > { %v899_v30 = vpack.c.bf16 %v891_v27, %v889_v26 }
 0x212   : > { %v900_v31 = vpack.c.bf16 %v892_v29, %v890_v28 }
 0x213   : > { %1052 = vmatmul.bf16.gmra.mxu2 %v899_v30 }
 0x214   : > { %1081 = vmatmul.bf16.gmra.mxu3 %v900_v31 }
 0x266   : > { %v1038_v1 = vpop.f32.mrf.mxu2 }
 0x267   : > { %v1067_v32 = vpop.f32.mrf.mxu3 }
 0x268   : > { %v1068_v33 = vadd.f32 %v1067_v32, %v1038_v1  ;;  %v1119_v1 = vld [vmem:[#allocation6] sm:$0x1] }
 0x26a   : > { %1087 = vst [vmem:[%s1739_s19] sm:$0xff] %v1068_v33  ;;  %v1111_v47 = vsel %vm313_vm0, %v1068_v33, 0.0 }
 0x26b   : > { %v1136_v52 = vmul.f32 %v1111_v47, %v1111_v47 }
 0x26e   : > { %v1040_v4 = vpop.f32.mrf.mxu2 }
 0x26f   : > { %v1069_v6 = vpop.f32.mrf.mxu3 }
 0x270   : > { %v1070_v34 = vadd.f32 %v1069_v6, %v1040_v4  ;;  %v1135_v4 = vld [vmem:[#allocation7] sm:$0x1] }
 0x272   : > { %1088 = vst [vmem:[%s1739_s19 + $0x8] sm:$0xff] %v1070_v34  ;;  %v1112_v46 = vsel %vm314_vm1, %v1070_v34, 0.0 }
 0x273   : > { %v1137_v49 = vmul.f32 %v1112_v46, %v1112_v46  ;;  %v1120_v53 = vadd.f32 %v1112_v46, %v1111_v47 }
 0x275   : > { %v1144_v57 = vadd.f32 %v1137_v49, %v1136_v52 }
 0x276   : > { %v1043_v8 = vpop.f32.mrf.mxu2 }
 0x277   : > { %v1072_v35 = vpop.f32.mrf.mxu3 }
 0x278   : > { %v1073_v36 = vadd.f32 %v1072_v35, %v1043_v8 }
 0x27a   : > { %1089 = vst [vmem:[%s1739_s19 + $0x10] sm:$0xff] %v1073_v36  ;;  %v1113_v48 = vsel %vm315_vm2, %v1073_v36, 0.0 }
 0x27b   : > { %v1138_v54 = vmul.f32 %v1113_v48, %v1113_v48  ;;  %v1121_v10 = vadd.f32 %v1120_v53, %v1113_v48 }
 0x27d   : > { %v1145_v59 = vadd.f32 %v1144_v57, %v1138_v54 }
 0x27e   : > { %v1045_v37 = vpop.f32.mrf.mxu2 }
 0x27f   : > { %v1074_v38 = vpop.f32.mrf.mxu3 }
 0x280   : > { %v1075_v39 = vadd.f32 %v1074_v38, %v1045_v37 }
 0x282   : > { %1090 = vst [vmem:[%s1739_s19 + $0x18] sm:$0xff] %v1075_v39  ;;  %v1114_v50 = vsel %vm316_vm3, %v1075_v39, 0.0 }
 0x283   : > { %v1139_v58 = vmul.f32 %v1114_v50, %v1114_v50  ;;  %v1122_v13 = vadd.f32 %v1121_v10, %v1114_v50 }
 0x285   : > { %v1146_v62 = vadd.f32 %v1145_v59, %v1139_v58 }
 0x286   : > { %v1048_v40 = vpop.f32.mrf.mxu2 }
 0x287   : > { %v1077_v41 = vpop.f32.mrf.mxu3 }
 0x288   : > { %v1078_v42 = vadd.f32 %v1077_v41, %v1048_v40 }
 0x28a   : > { %1091 = vst [vmem:[%s1739_s19 + $0x20] sm:$0xff] %v1078_v42  ;;  %v1115_v11 = vsel %vm317_vm4, %v1078_v42, 0.0 }
 0x28b   : > { %v1140_v60 = vmul.f32 %v1115_v11, %v1115_v11  ;;  %v1123_v63 = vadd.f32 %v1122_v13, %v1115_v11 }
 0x28d   : > { %v1147_v3 = vadd.f32 %v1146_v62, %v1140_v60 }
 0x28e   : > { %v1050_v43 = vpop.f32.mrf.mxu2 }
 0x28f   : > { %v1079_v44 = vpop.f32.mrf.mxu3 }
 0x290   : > { %v1080_v45 = vadd.f32 %v1079_v44, %v1050_v43 }
 0x292   : > { %1092 = vst [vmem:[%s1739_s19 + $0x28] sm:$0xff] %v1080_v45  ;;  %v1116_v12 = vsel %vm318_vm5, %v1080_v45, 0.0 }
 0x293   : > { %v1141_v2 = vmul.f32 %v1116_v12, %v1116_v12  ;;  %v1124_v5 = vadd.f32 %v1123_v63, %v1116_v12 }
 0x295   : > { %v1148_v19 = vadd.f32 %v1147_v3, %v1141_v2 }
 0x296   : > { %v1053_v51 = vpop.f32.mrf.mxu2 }
 0x297   : > { %v1082_v55 = vpop.f32.mrf.mxu3 }
 0x298   : > { %v1083_v56 = vadd.f32 %v1082_v55, %v1053_v51 }
 0x29a   : > { %1093 = vst [vmem:[%s1739_s19 + $0x30] sm:$0xff] %v1083_v56  ;;  %v1117_v61 = vsel %vm319_vm6, %v1083_v56, 0.0 }
 0x29b   : > { %v1142_v7 = vmul.f32 %v1117_v61, %v1117_v61  ;;  %v1125_v15 = vadd.f32 %v1124_v5, %v1117_v61 }
 0x29d   : > { %v1149_v21 = vadd.f32 %v1148_v19, %v1142_v7 }
 0x29e   : > { %v1055_v14 = vpop.f32.mrf.mxu2 }
 0x29f   : > { %v1084_v9 = vpop.f32.mrf.mxu3 }
 0x2a0   : > { %v1085_v18 = vadd.f32 %v1084_v9, %v1055_v14 }
 0x2a2   : > { %1094 = vst [vmem:[%s1739_s19 + $0x38] sm:$0xff] %v1085_v18  ;;  %v1118_v20 = vsel %vm320_vm7, %v1085_v18, 0.0 }
 0x2a3   : > { %v1126_v22 = vadd.f32 %v1125_v15, %v1118_v20  ;;  %v1143_v23 = vmul.f32 %v1118_v20, %v1118_v20 }
 0x2a5   : > { %v1127_v16 = vrot.slane %v1126_v22, 4  ;;  %v1150_v24 = vadd.f32 %v1149_v21, %v1143_v23 }
 0x2a7   : > { %v1128_v0 = vadd.f32 %v1127_v16, %v1126_v22  ;;  %v1151_v25 = vrot.slane %v1150_v24, 4 }
 0x2a9   : > { %v1129_v26 = vrot.slane %v1128_v0, 2  ;;  %v1152_v27 = vadd.f32 %v1151_v25, %v1150_v24 }
 0x2ab   : > { %v1130_v28 = vadd.f32 %v1129_v26, %v1128_v0  ;;  %v1153_v29 = vrot.slane %v1152_v27, 2 }
 0x2ad   : > { %v1131_v30 = vrot.slane %v1130_v28, 1  ;;  %v1154_v31 = vadd.f32 %v1153_v29, %v1152_v27 }
 0x2af   : > { %v1132_v32 = vadd.f32 %v1131_v30, %v1130_v28  ;;  %v1155_v33 = vrot.slane %v1154_v31, 1 }
 0x2b1   : > { %v1133_v6 = vadd.f32 %v1132_v32, %v1119_v1  ;;  %v1156_v17 = vadd.f32 %v1155_v33, %v1154_v31  ;;  %1162 = sbr.rel (%p1474_p11) target bundleno = 730 (0x2da), region = 60 }
 0x2b3   : > { %1134 = vst [vmem:[#allocation6] sm:$0x1] %v1133_v6  ;;  %v1157_v34 = vadd.f32 %v1156_v17, %v1135_v4 }
 0x2b5   : > { %1158 = vst [vmem:[#allocation7] sm:$0x1] %v1157_v34 }
 0x2ba   : > { %v1163_v8 = vld [vmem:[#allocation6] sm:$0x1] }
 0x2bb   : > { %v1164_v36 = vmul.f32 0.005, %v1163_v8 }
 0x2bc   : > { %v1165_v35 = vld [vmem:[#allocation7] sm:$0x1] }
 0x2bd   : > { %v1166_v37 = vmul.f32 0.005, %v1165_v35  ;;  %v1167_v38 = vmul.f32 %v1164_v36, %v1164_v36  ;;  %v1182_v47 = vsub.f32 0.0, %v1164_v36 }
 0x2bf   : > { %v1168_v39 = vsub.f32 %v1166_v37, %v1167_v38 }
 0x2c1   : > { %v1169_v40 = vmax.f32 %v1168_v39, 0.0 }
 0x2c3   : > { %v1170_v41 = vadd.f32 1e-05, %v1169_v40 }
 0x2c5   : > { %1584 = vrsqrt.f32 %v1170_v41  ;;  %vm1177_vm14 = vweird.f32 %v1170_v41 }
 0x2cb   : > { %v1585_v42 = vpop.eup %1584 }
 0x2cc   : > { %v1172_v43 = vmul.f32 %v1585_v42, %v1170_v41  ;;  %vm1178_vm15 = vweird.f32 %v1585_v42 }
 0x2cd   : > { %vm1179_vm0 = vmor %vm1177_vm14, %vm1178_vm15 }
 0x2ce   : > { %v1173_v44 = vmul.f32 %v1585_v42, %v1172_v43 }
 0x2d0   : > { %v1174_v45 = vmul.f32 0.5, %v1173_v44 }
 0x2d2   : > { %v1175_v46 = vsub.f32 1.5, %v1174_v45 }
 0x2d4   : > { %v1176_v48 = vmul.f32 %v1585_v42, %v1175_v46 }
 0x2d6   : > { %v1180_v49 = vsel %vm1179_vm0, %v1585_v42, %v1176_v48 }
 0x2d7   : > { %1181 = vst [vmem:[%s2159_s6] sm:$0x1] %v1180_v49  ;;  %v1183_v50 = vmul.f32 %v1182_v47, %v1180_v49 }
 0x2d9   : > { %1184 = vst [vmem:[%s2160_s7] sm:$0x1] %v1183_v50 }
 0x2da PF: > { %s18_s28 = sadd.s32 1, %s1624_s28   ;;  %s2163_s24 = smov %s1616_s26 }
 0x2db   : > { %p15_p12 = scmp.ge.s32.totalorder %s18_s28, 10   ;;  %s2164_s25 = smov %s1620_s27 }
 0x2dc   : > { %s2165_s26 = smov %s2168_s29  ;;  %s2166_s27 = smov %s2172_s30 }
 0x2dd   :  { %17 = sbr.rel (!%p15_p12) target bundleno = 3 (0x3), region = 106 }

</bundles_post_ra>
